<compile_context>
chip_gen: v7x
topology: tpu7x:2x2x1
jax: 0.10.0
libtpu: 0.0.40
codegen_flags: <defaults>
</compile_context>

<pallas_src>
import functools
import math

import jax
import jax.numpy as jnp
from jax.experimental import pallas as pl
from jax.experimental.pallas import tpu as pltpu


# ----------------------------------------------------------------------------
# Pallas kernel: multi-head self-attention for one block of batch elements.
# ----------------------------------------------------------------------------
def _make_mhsa_kernel(num_heads: int, head_dim: int, seq_len: int, embed: int,
                      b_blk: int):
    H, D, S, E = num_heads, head_dim, seq_len, embed
    M = b_blk * S          # rows presented to the MXU per projection
    BH = H * b_blk         # batched attention problems per step

    def kernel(x_ref, wqkv_ref, bqkv_ref, wo_ref, bo_ref, o_ref):
        # x block: (b_blk, S, E) f32 -> (M, E) bf16 (cast hidden under matmuls)
        x = x_ref[...].astype(jnp.bfloat16).reshape(M, E)

        # Fused Q/K/V projection over all blocked batch rows:
        # one (M, E) @ (E, 3E) MXU pass, f32 accumulate, one bias add.
        # The 1/sqrt(D) scale is already folded into the Q columns and bias.
        qkv = jnp.dot(x, wqkv_ref[...], preferred_element_type=jnp.float32)
        qkv = (qkv + bqkv_ref[...]).astype(jnp.bfloat16)        # single cast

        # Head split: static lane slices -> (H, M, D) -> (H*b_blk, S, D).
        # Leading/sublane reshape is tile-aligned (S is a multiple of 8/16).
        def split(base):
            heads = jnp.stack(
                [qkv[:, base + h * D: base + (h + 1) * D] for h in range(H)],
                axis=0)                                         # (H, M, D)
            return heads.reshape(BH, S, D)

        q = split(0)         # already scaled by 1/sqrt(D)
        k = split(E)
        v = split(2 * E)

        # scores = q @ k^T  -> (BH, S, S), f32
        scores = jnp.einsum("bqd,bkd->bqk", q, k,
                            preferred_element_type=jnp.float32)

        # numerically stable softmax statistics along the key axis (f32)
        m = jnp.max(scores, axis=-1, keepdims=True)
        p = jnp.exp(scores - m)
        l = jnp.sum(p, axis=-1, keepdims=True)

        # context from unnormalized probabilities, then post-PV normalization:
        # scales (BH, S, D) instead of (BH, S, S); EUP reciprocal on its own slot.
        ctx = jnp.einsum("bqk,bkd->bqd", p.astype(jnp.bfloat16), v,
                         preferred_element_type=jnp.float32)
        ctx = (ctx * pl.reciprocal(l, approx=True)).astype(jnp.bfloat16)

        # combine_heads with the head merge folded into the contraction:
        # out[m, e] = sum_h ctx_h[m, :] @ wo[h]  (no concatenate, no relayout)
        ctx0 = ctx[0:b_blk].reshape(M, D)
        out = bo_ref[...] + jnp.dot(ctx0, wo_ref[0],
                                    preferred_element_type=jnp.float32)
        for h in range(1, H):
            ctx_h = ctx[h * b_blk:(h + 1) * b_blk].reshape(M, D)
            out = out + jnp.dot(ctx_h, wo_ref[h],
                                preferred_element_type=jnp.float32)

        # Emit NCHW-ready layout (b_blk, E, S): one small in-kernel transpose
        # on the otherwise-idle XLU; wrapper reshape to (b, E, h, w) is a view.
        out = out.reshape(b_blk, S, E)
        o_ref[...] = jnp.transpose(out, (0, 2, 1)).astype(o_ref.dtype)

    return kernel


# ----------------------------------------------------------------------------
# One-time parameter preparation (hoisted out of the forward call).
# ----------------------------------------------------------------------------
def prepare_params(params, num_heads: int):
    """Transpose to (in,out), fuse QKV, fold 1/sqrt(D) into Q, split wo per head."""
    E = params["wq"].shape[0]
    assert E % num_heads == 0
    D = E // num_heads
    scale = 1.0 / math.sqrt(D)

    wqkv = jnp.concatenate(
        [params["wq"].T * scale, params["wk"].T, params["wv"].T], axis=1)
    bqkv = jnp.concatenate(
        [params["bq"] * scale, params["bk"], params["bv"]]).reshape(1, 3 * E)
    wo_heads = params["wo"].T.reshape(num_heads, D, E)   # (H, D, E)
    return {
        "wqkv": wqkv.astype(jnp.bfloat16),                # (E, 3E)
        "bqkv": bqkv.astype(jnp.float32),                 # (1, 3E)
        "wo_heads": wo_heads.astype(jnp.bfloat16),        # (H, D, E)
        "bo": params["bo"].reshape(1, E).astype(jnp.float32),
    }


# ----------------------------------------------------------------------------
# Wrapper: reshape glue + pallas_call setup.
# ----------------------------------------------------------------------------
def multi_head_self_attention(x_nchw, fused, num_heads: int, b_blk=None):
    """x_nchw: (b, c, h, w) with c == embed_size. Returns (b, embed_size, h, w)."""
    b, c, h, w = x_nchw.shape
    E = c
    assert E % num_heads == 0
    D = E // num_heads
    S = h * w

    if b_blk is None:
        # Grid length 2 keeps both v7x TensorCores busy; each step still folds
        # b_blk batch elements into the MXU M dimension. On single-TC v5e/v6e
        # pass b_blk=b for one fat step (M = b*S rows).
        b_blk = b if (b % 2) else max(1, b // 2)
    assert b % b_blk == 0
    n_blocks = b // b_blk

    # Raw reshape, exactly as torch: x.reshape(b, h*w, -1). Free view; the
    # f32 -> bf16 cast happens inside the kernel (no standalone XLA pass).
    x_seq = jnp.reshape(x_nchw, (b, S, E))

    kernel = _make_mhsa_kernel(num_heads, D, S, E, b_blk)

    out_es = pl.pallas_call(
        kernel,
        out_shape=jax.ShapeDtypeStruct((b, E, S), jnp.float32),
        grid_spec=pltpu.PrefetchScalarGridSpec(
            num_scalar_prefetch=0,
            grid=(n_blocks,),
            in_specs=[
                pl.BlockSpec((b_blk, S, E), lambda i: (i, 0, 0)),      # x
                pl.BlockSpec((E, 3 * E), lambda i: (0, 0)),            # fused QKV W
                pl.BlockSpec((1, 3 * E), lambda i: (0, 0)),            # fused QKV b
                pl.BlockSpec((num_heads, D, E), lambda i: (0, 0, 0)),  # wo per head
                pl.BlockSpec((1, E), lambda i: (0, 0)),                # bo
            ],
            out_specs=pl.BlockSpec((b_blk, E, S), lambda i: (i, 0, 0)),
        ),
        compiler_params=pltpu.CompilerParams(
            dimension_semantics=("parallel",)),
    )(x_seq, fused["wqkv"], fused["bqkv"], fused["wo_heads"], fused["bo"])

    # (b, E, S) -> (b, E, h, w): identical to torch's
    # output.reshape(b, h, w, E).permute(0, 3, 1, 2); pure view, no transpose op.
    return out_es.reshape(b, E, h, w)


# ----------------------------------------------------------------------------
# Deterministic parameter init (xavier_uniform weights, zero biases).
# ----------------------------------------------------------------------------
def init_params(key, embed_size: int):
    def xavier(k, shape):
        fan_in, fan_out = shape[1], shape[0]
        bound = math.sqrt(6.0 / (fan_in + fan_out))
        return jax.random.uniform(k, shape, jnp.float32, -bound, bound)

    k1, k2, k3, k4 = jax.random.split(key, 4)
    z = jnp.zeros((embed_size,), jnp.float32)
    return {
        "wq": xavier(k1, (embed_size, embed_size)), "bq": z,
        "wk": xavier(k2, (embed_size, embed_size)), "bk": z,
        "wv": xavier(k3, (embed_size, embed_size)), "bv": z,
        "wo": xavier(k4, (embed_size, embed_size)), "bo": z,
    }


# ----------------------------------------------------------------------------
# Pure-JAX f32 reference (mirrors the torch forward exactly).
# ----------------------------------------------------------------------------
def reference(x_nchw, params, num_heads):
    b, c, h, w = x_nchw.shape
    E = c
    D = E // num_heads
    x = x_nchw.reshape(b, h * w, E)

    def lin(t, W, bvec):
        return jnp.einsum("bse,oe->bso", t, W) + bvec

    def split(t):
        return t.reshape(b, -1, num_heads, D).transpose(0, 2, 1, 3)

    q = split(lin(x, params["wq"], params["bq"]))
    k = split(lin(x, params["wk"], params["bk"]))
    v = split(lin(x, params["wv"], params["bv"]))
    scores = jnp.einsum("bhqd,bhkd->bhqk", q, k) / math.sqrt(D)
    wts = jax.nn.softmax(scores, axis=-1)
    attn = jnp.einsum("bhqk,bhkd->bhqd", wts, v)
    attn = attn.transpose(0, 2, 1, 3).reshape(b, -1, E)
    out = lin(attn, params["wo"], params["bo"])
    return out.reshape(b, h, w, E).transpose(0, 3, 1, 2)


if __name__ == "__main__":
    # Small shapes consistent with the module: channels == embed_size.
    batch, embed_size, num_heads, height, width = 4, 32, 4, 8, 8

    key = jax.random.PRNGKey(0)
    kx, kp = jax.random.split(key)
    x = jax.random.normal(kx, (batch, embed_size, height, width), jnp.float32)
    params = init_params(kp, embed_size)

    fused = prepare_params(params, num_heads)          # one-time prep
    fwd = jax.jit(functools.partial(multi_head_self_attention,
                                    num_heads=num_heads))

    out = jax.block_until_ready(fwd(x, fused))

    ref = reference(x, params, num_heads)
    assert out.shape == (batch, embed_size, height, width)
    # bf16 MXU operands + approx reciprocal -> loosened tolerances vs f32 ref.
    max_err = float(jnp.max(jnp.abs(out - ref)))
    rel_err = float(jnp.linalg.norm(out - ref) / jnp.linalg.norm(ref))
    assert max_err < 1e-1 and rel_err < 5e-2, (max_err, rel_err)

    print("KERNEL_OK")
</pallas_src>

<mosaic_0001>
module attributes {stable_mosaic.version = 11 : i64} {
  func.func @kernel(%arg0: i32, %arg1: memref<2x64x32xf32, #tpu.memory_space<vmem>>, %arg2: memref<32x96xbf16, #tpu.memory_space<vmem>>, %arg3: memref<1x96xf32, #tpu.memory_space<vmem>>, %arg4: memref<4x8x32xbf16, #tpu.memory_space<vmem>>, %arg5: memref<1x32xf32, #tpu.memory_space<vmem>>, %arg6: memref<2x32x64xf32, #tpu.memory_space<vmem>>) attributes {dimension_semantics = [#tpu.dimension_semantics<parallel>], iteration_bounds = array<i64: 2>, scalar_prefetch = 0 : i64, scratch_operands = 0 : i64, tpu.core_type = #tpu.core_type<tc>, window_params = [{transform_indices = @transform_0, window_bounds = array<i64: 2, 64, 32>}, {pipeline_mode = #tpu.pipeline_mode<synchronous>, transform_indices = @transform_1, window_bounds = array<i64: 32, 96>}, {pipeline_mode = #tpu.pipeline_mode<synchronous>, transform_indices = @transform_2, window_bounds = array<i64: 1, 96>}, {pipeline_mode = #tpu.pipeline_mode<synchronous>, transform_indices = @transform_3, window_bounds = array<i64: 4, 8, 32>}, {pipeline_mode = #tpu.pipeline_mode<synchronous>, transform_indices = @transform_4, window_bounds = array<i64: 1, 32>}, {transform_indices = @transform_5, window_bounds = array<i64: 2, 32, 64>}]} {
    %c0 = arith.constant 0 : index
    %c0_0 = arith.constant 0 : index
    %c0_1 = arith.constant 0 : index
    %0 = vector.load %arg1[%c0, %c0_0, %c0_1] : memref<2x64x32xf32, #tpu.memory_space<vmem>>, vector<2x64x32xf32>
    %1 = arith.truncf %0 : vector<2x64x32xf32> to vector<2x64x32xbf16>
    %2 = vector.shape_cast %1 : vector<2x64x32xbf16> to vector<128x32xbf16>
    %c0_2 = arith.constant 0 : index
    %c0_3 = arith.constant 0 : index
    %3 = vector.load %arg2[%c0_2, %c0_3] : memref<32x96xbf16, #tpu.memory_space<vmem>>, vector<32x96xbf16>
    %cst = arith.constant dense<0.000000e+00> : vector<128x96xf32>
    %4 = tpu.matmul %2, %3, %cst {dimension_numbers = #tpu.dot_dimension_numbers<[1], [0], [0], [1], [0, 0, 1, 1], [], []>} : vector<128x32xbf16>, vector<32x96xbf16>, vector<128x96xf32> -> vector<128x96xf32>
    %c0_4 = arith.constant 0 : index
    %c0_5 = arith.constant 0 : index
    %5 = vector.load %arg3[%c0_4, %c0_5] : memref<1x96xf32, #tpu.memory_space<vmem>>, vector<1x96xf32>
    %6 = vector.broadcast %5 : vector<1x96xf32> to vector<128x96xf32>
    %7 = arith.addf %4, %6 : vector<128x96xf32>
    %8 = arith.truncf %7 : vector<128x96xf32> to vector<128x96xbf16>
    %9 = vector.extract_strided_slice %8 {offsets = [0, 0], sizes = [128, 8], strides = [1, 1]} : vector<128x96xbf16> to vector<128x8xbf16>
    %10 = vector.extract_strided_slice %8 {offsets = [0, 8], sizes = [128, 8], strides = [1, 1]} : vector<128x96xbf16> to vector<128x8xbf16>
    %11 = vector.extract_strided_slice %8 {offsets = [0, 16], sizes = [128, 8], strides = [1, 1]} : vector<128x96xbf16> to vector<128x8xbf16>
    %12 = vector.extract_strided_slice %8 {offsets = [0, 24], sizes = [128, 8], strides = [1, 1]} : vector<128x96xbf16> to vector<128x8xbf16>
    %13 = vector.shape_cast %9 : vector<128x8xbf16> to vector<1x128x8xbf16>
    %14 = vector.shape_cast %10 : vector<128x8xbf16> to vector<1x128x8xbf16>
    %15 = vector.shape_cast %11 : vector<128x8xbf16> to vector<1x128x8xbf16>
    %16 = vector.shape_cast %12 : vector<128x8xbf16> to vector<1x128x8xbf16>
    %17 = tpu.concatenate %13, %14, %15, %16 in 0 : vector<1x128x8xbf16>, vector<1x128x8xbf16>, vector<1x128x8xbf16>, vector<1x128x8xbf16> -> vector<4x128x8xbf16>
    %18 = vector.shape_cast %17 : vector<4x128x8xbf16> to vector<8x64x8xbf16>
    %19 = vector.extract_strided_slice %8 {offsets = [0, 32], sizes = [128, 8], strides = [1, 1]} : vector<128x96xbf16> to vector<128x8xbf16>
    %20 = vector.extract_strided_slice %8 {offsets = [0, 40], sizes = [128, 8], strides = [1, 1]} : vector<128x96xbf16> to vector<128x8xbf16>
    %21 = vector.extract_strided_slice %8 {offsets = [0, 48], sizes = [128, 8], strides = [1, 1]} : vector<128x96xbf16> to vector<128x8xbf16>
    %22 = vector.extract_strided_slice %8 {offsets = [0, 56], sizes = [128, 8], strides = [1, 1]} : vector<128x96xbf16> to vector<128x8xbf16>
    %23 = vector.shape_cast %19 : vector<128x8xbf16> to vector<1x128x8xbf16>
    %24 = vector.shape_cast %20 : vector<128x8xbf16> to vector<1x128x8xbf16>
    %25 = vector.shape_cast %21 : vector<128x8xbf16> to vector<1x128x8xbf16>
    %26 = vector.shape_cast %22 : vector<128x8xbf16> to vector<1x128x8xbf16>
    %27 = tpu.concatenate %23, %24, %25, %26 in 0 : vector<1x128x8xbf16>, vector<1x128x8xbf16>, vector<1x128x8xbf16>, vector<1x128x8xbf16> -> vector<4x128x8xbf16>
    %28 = vector.shape_cast %27 : vector<4x128x8xbf16> to vector<8x64x8xbf16>
    %29 = vector.extract_strided_slice %8 {offsets = [0, 64], sizes = [128, 8], strides = [1, 1]} : vector<128x96xbf16> to vector<128x8xbf16>
    %30 = vector.extract_strided_slice %8 {offsets = [0, 72], sizes = [128, 8], strides = [1, 1]} : vector<128x96xbf16> to vector<128x8xbf16>
    %31 = vector.extract_strided_slice %8 {offsets = [0, 80], sizes = [128, 8], strides = [1, 1]} : vector<128x96xbf16> to vector<128x8xbf16>
    %32 = vector.extract_strided_slice %8 {offsets = [0, 88], sizes = [128, 8], strides = [1, 1]} : vector<128x96xbf16> to vector<128x8xbf16>
    %33 = vector.shape_cast %29 : vector<128x8xbf16> to vector<1x128x8xbf16>
    %34 = vector.shape_cast %30 : vector<128x8xbf16> to vector<1x128x8xbf16>
    %35 = vector.shape_cast %31 : vector<128x8xbf16> to vector<1x128x8xbf16>
    %36 = vector.shape_cast %32 : vector<128x8xbf16> to vector<1x128x8xbf16>
    %37 = tpu.concatenate %33, %34, %35, %36 in 0 : vector<1x128x8xbf16>, vector<1x128x8xbf16>, vector<1x128x8xbf16>, vector<1x128x8xbf16> -> vector<4x128x8xbf16>
    %38 = vector.shape_cast %37 : vector<4x128x8xbf16> to vector<8x64x8xbf16>
    "tpu.trace_start"() <{level = 10 : i32, message = "bqd,bkd->bqk"}> : () -> ()
    %cst_6 = arith.constant dense<0.000000e+00> : vector<8x64x64xf32>
    %39 = tpu.matmul %18, %28, %cst_6 {dimension_numbers = #tpu.dot_dimension_numbers<[2], [2], [1], [1], [0, 0, 0, 1, 1, 1], [0], [0]>} : vector<8x64x8xbf16>, vector<8x64x8xbf16>, vector<8x64x64xf32> -> vector<8x64x64xf32>
    "tpu.trace_stop"() : () -> ()
    %cst_7 = arith.constant dense<0xFF800000> : vector<8x64xf32>
    %40 = vector.multi_reduction <maximumf>, %39, %cst_7 [2] : vector<8x64x64xf32> to vector<8x64xf32>
    %41 = vector.shape_cast %40 : vector<8x64xf32> to vector<8x64x1xf32>
    %42 = vector.broadcast %41 : vector<8x64x1xf32> to vector<8x64x64xf32>
    %43 = arith.subf %39, %42 : vector<8x64x64xf32>
    %44 = math.exp %43 : vector<8x64x64xf32>
    %cst_8 = arith.constant dense<0.000000e+00> : vector<8x64xf32>
    %45 = vector.multi_reduction <add>, %44, %cst_8 [2] : vector<8x64x64xf32> to vector<8x64xf32>
    %46 = vector.shape_cast %45 : vector<8x64xf32> to vector<8x64x1xf32>
    %47 = arith.truncf %44 : vector<8x64x64xf32> to vector<8x64x64xbf16>
    "tpu.trace_start"() <{level = 10 : i32, message = "bqk,bkd->bqd"}> : () -> ()
    %cst_9 = arith.constant dense<0.000000e+00> : vector<8x64x8xf32>
    %48 = tpu.matmul %47, %38, %cst_9 {dimension_numbers = #tpu.dot_dimension_numbers<[2], [1], [1], [2], [0, 0, 0, 1, 1, 2], [0], [0]>} : vector<8x64x64xbf16>, vector<8x64x8xbf16>, vector<8x64x8xf32> -> vector<8x64x8xf32>
    "tpu.trace_stop"() : () -> ()
    %49 = tpu.reciprocal %46 {approx = true} : vector<8x64x1xf32> -> vector<8x64x1xf32>
    %50 = vector.broadcast %49 : vector<8x64x1xf32> to vector<8x64x8xf32>
    %51 = arith.mulf %48, %50 : vector<8x64x8xf32>
    %52 = arith.truncf %51 : vector<8x64x8xf32> to vector<8x64x8xbf16>
    %53 = vector.extract_strided_slice %52 {offsets = [0, 0, 0], sizes = [2, 64, 8], strides = [1, 1, 1]} : vector<8x64x8xbf16> to vector<2x64x8xbf16>
    %54 = vector.shape_cast %53 : vector<2x64x8xbf16> to vector<128x8xbf16>
    %c0_10 = arith.constant 0 : index
    %c0_11 = arith.constant 0 : index
    %55 = vector.load %arg5[%c0_10, %c0_11] : memref<1x32xf32, #tpu.memory_space<vmem>>, vector<1x32xf32>
    %c0_12 = arith.constant 0 : index
    %c0_13 = arith.constant 0 : index
    %c0_14 = arith.constant 0 : index
    %56 = vector.load %arg4[%c0_12, %c0_13, %c0_14] : memref<4x8x32xbf16, #tpu.memory_space<vmem>>, vector<1x8x32xbf16>
    %57 = vector.shape_cast %56 : vector<1x8x32xbf16> to vector<8x32xbf16>
    %cst_15 = arith.constant dense<0.000000e+00> : vector<128x32xf32>
    %58 = tpu.matmul %54, %57, %cst_15 {dimension_numbers = #tpu.dot_dimension_numbers<[1], [0], [0], [1], [0, 0, 1, 1], [], []>} : vector<128x8xbf16>, vector<8x32xbf16>, vector<128x32xf32> -> vector<128x32xf32>
    %59 = vector.broadcast %55 : vector<1x32xf32> to vector<128x32xf32>
    %60 = arith.addf %59, %58 : vector<128x32xf32>
    %61 = vector.extract_strided_slice %52 {offsets = [2, 0, 0], sizes = [2, 64, 8], strides = [1, 1, 1]} : vector<8x64x8xbf16> to vector<2x64x8xbf16>
    %62 = vector.shape_cast %61 : vector<2x64x8xbf16> to vector<128x8xbf16>
    %c1 = arith.constant 1 : index
    %c0_16 = arith.constant 0 : index
    %c0_17 = arith.constant 0 : index
    %63 = vector.load %arg4[%c1, %c0_16, %c0_17] : memref<4x8x32xbf16, #tpu.memory_space<vmem>>, vector<1x8x32xbf16>
    %64 = vector.shape_cast %63 : vector<1x8x32xbf16> to vector<8x32xbf16>
    %cst_18 = arith.constant dense<0.000000e+00> : vector<128x32xf32>
    %65 = tpu.matmul %62, %64, %cst_18 {dimension_numbers = #tpu.dot_dimension_numbers<[1], [0], [0], [1], [0, 0, 1, 1], [], []>} : vector<128x8xbf16>, vector<8x32xbf16>, vector<128x32xf32> -> vector<128x32xf32>
    %66 = arith.addf %60, %65 : vector<128x32xf32>
    %67 = vector.extract_strided_slice %52 {offsets = [4, 0, 0], sizes = [2, 64, 8], strides = [1, 1, 1]} : vector<8x64x8xbf16> to vector<2x64x8xbf16>
    %68 = vector.shape_cast %67 : vector<2x64x8xbf16> to vector<128x8xbf16>
    %c2 = arith.constant 2 : index
    %c0_19 = arith.constant 0 : index
    %c0_20 = arith.constant 0 : index
    %69 = vector.load %arg4[%c2, %c0_19, %c0_20] : memref<4x8x32xbf16, #tpu.memory_space<vmem>>, vector<1x8x32xbf16>
    %70 = vector.shape_cast %69 : vector<1x8x32xbf16> to vector<8x32xbf16>
    %cst_21 = arith.constant dense<0.000000e+00> : vector<128x32xf32>
    %71 = tpu.matmul %68, %70, %cst_21 {dimension_numbers = #tpu.dot_dimension_numbers<[1], [0], [0], [1], [0, 0, 1, 1], [], []>} : vector<128x8xbf16>, vector<8x32xbf16>, vector<128x32xf32> -> vector<128x32xf32>
    %72 = arith.addf %66, %71 : vector<128x32xf32>
    %73 = vector.extract_strided_slice %52 {offsets = [6, 0, 0], sizes = [2, 64, 8], strides = [1, 1, 1]} : vector<8x64x8xbf16> to vector<2x64x8xbf16>
    %74 = vector.shape_cast %73 : vector<2x64x8xbf16> to vector<128x8xbf16>
    %c3 = arith.constant 3 : index
    %c0_22 = arith.constant 0 : index
    %c0_23 = arith.constant 0 : index
    %75 = vector.load %arg4[%c3, %c0_22, %c0_23] : memref<4x8x32xbf16, #tpu.memory_space<vmem>>, vector<1x8x32xbf16>
    %76 = vector.shape_cast %75 : vector<1x8x32xbf16> to vector<8x32xbf16>
    %cst_24 = arith.constant dense<0.000000e+00> : vector<128x32xf32>
    %77 = tpu.matmul %74, %76, %cst_24 {dimension_numbers = #tpu.dot_dimension_numbers<[1], [0], [0], [1], [0, 0, 1, 1], [], []>} : vector<128x8xbf16>, vector<8x32xbf16>, vector<128x32xf32> -> vector<128x32xf32>
    %78 = arith.addf %72, %77 : vector<128x32xf32>
    %79 = vector.shape_cast %78 : vector<128x32xf32> to vector<2x64x32xf32>
    %80 = tpu.transpose %79, [0, 2, 1] : vector<2x64x32xf32> -> vector<2x32x64xf32>
    %c0_25 = arith.constant 0 : index
    %c0_26 = arith.constant 0 : index
    %c0_27 = arith.constant 0 : index
    %81 = vector.load %arg6[%c0_25, %c0_26, %c0_27] : memref<2x32x64xf32, #tpu.memory_space<vmem>>, vector<2x32x64xf32>
    tpu.vector_store %arg6[%c0_25, %c0_26, %c0_27], %80 {strides = array<i32>} : memref<2x32x64xf32, #tpu.memory_space<vmem>>, vector<2x32x64xf32>,
    return
  }
  func.func @transform_0(%arg0: i32) -> (i32, i32, i32) {
    %c0_i32 = arith.constant 0 : i32
    %c0_i32_0 = arith.constant 0 : i32
    %c0_i32_1 = arith.constant 0 : i32
    return %arg0, %c0_i32, %c0_i32_0 : i32, i32, i32
  }
  func.func @transform_1(%arg0: i32) -> (i32, i32) {
    %c0_i32 = arith.constant 0 : i32
    %c0_i32_0 = arith.constant 0 : i32
    %c0_i32_1 = arith.constant 0 : i32
    return %c0_i32, %c0_i32_0 : i32, i32
  }
  func.func @transform_2(%arg0: i32) -> (i32, i32) {
    %c0_i32 = arith.constant 0 : i32
    %c0_i32_0 = arith.constant 0 : i32
    %c0_i32_1 = arith.constant 0 : i32
    return %c0_i32, %c0_i32_0 : i32, i32
  }
  func.func @transform_3(%arg0: i32) -> (i32, i32, i32) {
    %c0_i32 = arith.constant 0 : i32
    %c0_i32_0 = arith.constant 0 : i32
    %c0_i32_1 = arith.constant 0 : i32
    %c0_i32_2 = arith.constant 0 : i32
    return %c0_i32, %c0_i32_0, %c0_i32_1 : i32, i32, i32
  }
  func.func @transform_4(%arg0: i32) -> (i32, i32) {
    %c0_i32 = arith.constant 0 : i32
    %c0_i32_0 = arith.constant 0 : i32
    %c0_i32_1 = arith.constant 0 : i32
    return %c0_i32, %c0_i32_0 : i32, i32
  }
  func.func @transform_5(%arg0: i32) -> (i32, i32, i32) {
    %c0_i32 = arith.constant 0 : i32
    %c0_i32_0 = arith.constant 0 : i32
    %c0_i32_1 = arith.constant 0 : i32
    return %arg0, %c0_i32, %c0_i32_0 : i32, i32, i32
  }
}

</mosaic_0001>

<bundles_post_ra>
// kernel: multi_head_self_attention.1
= control target key start
LH: loop header
LB: loop body
LE: loop exit
PB: predicated region body
PF: predicated region fallthrough
CT: control target
= control target key end

     0   :  { %s4493_s18 = smov 0   ;;  %s5880_s0 = inlined_call_operand.vmem [shape: f32[4,64,32], index: 0, kind: input, shape index: {}]   ;;  %s5881_s1 = inlined_call_operand.vmem [shape: bf16[32,96], index: 1, kind: input, shape index: {}]   ;;  %s5882_s2 = inlined_call_operand.vmem [shape: f32[1,96], index: 2, kind: input, shape index: {}]   ;;  %s5883_s3 = inlined_call_operand.vmem [shape: bf16[4,8,32], index: 3, kind: input, shape index: {}]   ;;  %s5884_s4 = inlined_call_operand.vmem [shape: f32[1,32], index: 4, kind: input, shape index: {}]   ;;  %s5885_s5 = inlined_call_operand.vmem [shape: f32[4,32,64], index: 5, kind: output, shape index: {}]  }
   0x1 LB: > { %s3430_s19 = sadd.s32 4294967295, %s4456_s18   ;;  %p3434_p0 = scmp.ge.s32.totalorder %s4456_s18, 1  ;;  %s4456_s18 = sphi %s4493_s18, %s15_s18  }
   0x2   : > { %p189_p1 = scmp.lt.s32.totalorder %s4456_s18, 3 }
   0x4   : > { %p190_p2 = pnand %p3434_p0, %p189_p1 }
   0x6   : > { %193 = sbr.rel (%p190_p2) target bundleno = 1751 (0x6d7), region = 40 }
   0xd   : > { %v4192_v0 = vld [vmem:[%s5881_s1] sm:$0xff]   ;;  %s3435_s22 = sshll.u32 %s3430_s19, 1  ;;  %v4193_v1 = vld [vmem:[%s5881_s1 + $0x8] sm:$0xff]   ;;  %vm281_vm0 = vcmask 261120   ;;  %vm475_vm1 = vcmask 64512   ;;  %s4458_s6 = smov 96  }
   0xe   : > { %p220_p3 = scmp.lt.s32.totalorder %s3435_s22, 3  ;;  %3730 = vmatprep.subr.bf16.mxu0 %v4192_v0  ;;  %v3441_v27 = vld [vmem:[%s5882_s2] ss:$0 sm:$0xff]  ;;  %s4459_s7 = smov 120   ;;  %vm1244_vm2 = vcmask 523264   ;;  %vm2751_vm3 = vcmask 1043456  }
   0xf   : > { %3731 = vmatpush3.bf16.msra.mxu0 %v4192_v0  ;;  %s4460_s8 = smov 112   ;;  %s4461_s9 = smov 104  }
  0x10   : > { %s5994_s22 = smov (!%p220_p3, %s3435_s22), 3  ;;  %3732 = vmatprep.subr.bf16.mxu0 %v4193_v1  ;;  %s4462_s10 = smov 64  }
  0x11   : > { %s3554_s25 = sshll.u32 %s5994_s22, 6  ;;  %s3555_s23 = sshll.u32 %s5994_s22, 5 }
  0x12   : > { %s4513_s28 = scalar_lea.vmem %s5880_s0, %s3554_s25  ;;  %s231_s26 = scalar_lea.vmem %s5885_s5, %s3555_s23 }
  0x13   : > { %3733 = vmatpush3.bf16.msra.mxu0 %v4193_v1  ;;  %v234_v2 = vld [vmem:[%s4513_s28] sm:$0xff]  ;;  %v235_v3 = vld [vmem:[%s4513_s28 + $0x8] sm:$0xff]  ;;  %v236_v4 = vld [vmem:[%s4513_s28 + $0x10] sm:$0xff] }
  0x14   : > { %v250_v5 = vpack.c.bf16 %v235_v3, %v234_v2  ;;  %v237_v6 = vld [vmem:[%s4513_s28 + $0x18] sm:$0xff]  ;;  %v238_v7 = vld [vmem:[%s4513_s28 + $0x20] sm:$0xff]  ;;  %v239_v8 = vld [vmem:[%s4513_s28 + $0x28] sm:$0xff] }
  0x15   : > { %v251_v9 = vpack.c.bf16 %v237_v6, %v236_v4  ;;  %v252_v10 = vpack.c.bf16 %v239_v8, %v238_v7  ;;  %v240_v11 = vld [vmem:[%s4513_s28 + $0x30] sm:$0xff]  ;;  %v241_v12 = vld [vmem:[%s4513_s28 + $0x38] sm:$0xff]  ;;  %v242_v13 = vld [vmem:[%s4513_s28 + $0x40] sm:$0xff] }
  0x16   : > { %3734 = vmatprep.mubr.msk.bf16.mxu0 %vm281_vm0, %v250_v5  ;;  %v243_v14 = vld [vmem:[%s4513_s28 + $0x48] sm:$0xff]  ;;  %v253_v15 = vpack.c.bf16 %v241_v12, %v240_v11  ;;  %v244_v17 = vld [vmem:[%s4513_s28 + $0x50] sm:$0xff]  ;;  %v245_v18 = vld [vmem:[%s4513_s28 + $0x58] sm:$0xff] }
  0x17   : > { %3735 = vmatmul.mubr.msk.bf16.vlgmr.msra.gmra.mrb[0].mxu0 %vm281_vm0, %v251_v9  ;;  %v254_v16 = vpack.c.bf16 %v243_v14, %v242_v13  ;;  %v246_v19 = vld [vmem:[%s4513_s28 + $0x60] sm:$0xff]  ;;  %v247_v20 = vld [vmem:[%s4513_s28 + $0x68] sm:$0xff]  ;;  %v255_v21 = vpack.c.bf16 %v245_v18, %v244_v17  ;;  %v248_v23 = vld [vmem:[%s4513_s28 + $0x70] sm:$0xff] }
  0x18   : > { %3738 = vmatprep.mubr.msk.bf16.mxu0 %vm281_vm0, %v252_v10  ;;  %v256_v22 = vpack.c.bf16 %v247_v20, %v246_v19  ;;  %v249_v24 = vld [vmem:[%s4513_s28 + $0x78] sm:$0xff] }
  0x19   : > { %v257_v25 = vpack.c.bf16 %v249_v24, %v248_v23 }
  0x1f   : > { %3739 = vmatmul.mubr.msk.bf16.gmra.mrb[4].mxu0 %vm281_vm0, %v253_v15 }
  0x20   : > { %3742 = vmatprep.mubr.msk.bf16.mxu0 %vm281_vm0, %v254_v16 }
  0x27   : > { %3743 = vmatmul.mubr.msk.bf16.gmra.mrb[8].mxu0 %vm281_vm0, %v255_v21 }
  0x28   : > { %3746 = vmatprep.mubr.msk.bf16.mxu0 %vm281_vm0, %v256_v22 }
  0x2f   : > { %3747 = vmatmul.mubr.msk.bf16.gmra.mrb[12].mxu0 %vm281_vm0, %v257_v25 }
  0xea   : > { %v3736_v26 = vpop.f32.mrb[0].mxu0 }
  0xeb   : > { %v340_v28 = vpop.f32.mrb[1].mxu0  ;;  %v349_v30 = vadd.f32 %v3736_v26, %v3441_v27 }
  0xec   : > { %v3737_v29 = vpop.f32.mrb[2].mxu0  ;;  %v341_v33 = vadd.f32 %v3441_v27, %v340_v28 }
  0xed   : > { %v352_v31 = vadd.f32 %v3737_v29, %v3441_v27  ;;  %v343_v32 = vpop.f32.mrb[3].mxu0 }
  0xee   : > { %v344_v34 = vadd.f32 %v3441_v27, %v343_v32 }
  0xef   : > { %v4542_v35 = vpack.c.bf16 %v352_v31, %v349_v30 }
  0xf0   : > { %v4544_v36 = vpack.c.bf16 %v344_v34, %v341_v33 }
  0xf1   : > { %469 = vrot.lane.b32.xlu1 %v4542_v35, %s4458_s6 }
  0xf2   : > { %v3740_v37 = vpop.f32.mrb[4].mxu0  ;;  %467 = vrot.lane.b32.xlu0 %v4544_v36, %s4458_s6  ;;  %3758 = vmatprep.mubr.msk.bf16.mxu0 %vm475_vm1, %v4544_v36 }
  0xf3   : > { %v365_v38 = vadd.f32 %v3740_v37, %v3441_v27  ;;  %v356_v39 = vpop.f32.mrb[5].mxu0 }
  0xf4   : > { %v357_v40 = vadd.f32 %v3441_v27, %v356_v39  ;;  %v3741_v41 = vpop.f32.mrb[6].mxu0 }
  0xf5   : > { %v368_v42 = vadd.f32 %v3741_v41, %v3441_v27  ;;  %421 = vrot.lane.b32.xlu1 %v4542_v35, %s4459_s7  ;;  %v359_v43 = vpop.f32.mrb[7].mxu0 }
  0xf6   : > { %v360_v44 = vadd.f32 %v3441_v27, %v359_v43  ;;  %419 = vrot.lane.b32.xlu0 %v4544_v36, %s4459_s7 }
  0xf7   : > { %v4556_v45 = vpack.c.bf16 %v368_v42, %v365_v38 }
  0xf8   : > { %v4558_v46 = vpack.c.bf16 %v360_v44, %v357_v40 }
  0xfa   : > { %v3744_v47 = vpop.f32.mrb[8].mxu0  ;;  %423 = vrot.lane.b32.xlu1 %v4558_v46, %s4459_s7  ;;  %471 = vrot.lane.b32.xlu0 %v4558_v46, %s4458_s6 }
  0xfb   : > { %v381_v48 = vadd.f32 %v3744_v47, %v3441_v27  ;;  %v372_v49 = vpop.f32.mrb[9].mxu0 }
  0xfc   : > { %v373_v50 = vadd.f32 %v3441_v27, %v372_v49  ;;  %v3745_v51 = vpop.f32.mrb[10].mxu0 }
  0xfd   : > { %v384_v52 = vadd.f32 %v3745_v51, %v3441_v27  ;;  %v375_v53 = vpop.f32.mrb[11].mxu0 }
  0xfe   : > { %v376_v54 = vadd.f32 %v3441_v27, %v375_v53  ;;  %425 = vrot.lane.b32.xlu1 %v4556_v45, %s4459_s7  ;;  %473 = vrot.lane.b32.xlu0 %v4556_v45, %s4458_s6 }
  0xff   : > { %v4568_v55 = vpack.c.bf16 %v384_v52, %v381_v48 }
 0x100   : > { %v4570_v56 = vpack.c.bf16 %v376_v54, %v373_v50 }
 0x102   : > { %v3748_v57 = vpop.f32.mrb[12].mxu0  ;;  %427 = vrot.lane.b32.xlu1 %v4570_v56, %s4459_s7  ;;  %565 = vrot.lane.b32.xlu0 %v4570_v56, %s4458_s6 }
 0x103   : > { %v397_v58 = vadd.f32 %v3748_v57, %v3441_v27  ;;  %v388_v59 = vpop.f32.mrb[13].mxu0 }
 0x104   : > { %v389_v60 = vadd.f32 %v3441_v27, %v388_v59  ;;  %v3749_v61 = vpop.f32.mrb[14].mxu0 }
 0x105   : > { %v400_v62 = vadd.f32 %v3749_v61, %v3441_v27  ;;  %v391_v63 = vpop.f32.mrb[15].mxu0 }
 0x106   : > { %v392_v0 = vadd.f32 %v3441_v27, %v391_v63  ;;  %429 = vrot.lane.b32.xlu1 %v4568_v55, %s4459_s7  ;;  %567 = vrot.lane.b32.xlu0 %v4568_v55, %s4458_s6 }
 0x107   : > { %v4580_v1 = vpack.c.bf16 %v400_v62, %v397_v58 }
 0x108   : > { %v4582_v2 = vpack.c.bf16 %v392_v0, %v389_v60 }
 0x10a   : > { %431 = vrot.lane.b32.xlu1 %v4582_v2, %s4459_s7  ;;  %569 = vrot.lane.b32.xlu0 %v4582_v2, %s4458_s6 }
 0x10e   : > { %571 = vrot.lane.b32.xlu1 %v4580_v1, %s4458_s6  ;;  %435 = vrot.lane.b32.xlu0 %v4544_v36, %s4460_s8 }
 0x112   : > { %437 = vrot.lane.b32.xlu1 %v4542_v35, %s4460_s8  ;;  %433 = vrot.lane.b32.xlu0 %v4580_v1, %s4459_s7 }
 0x116   : > { %439 = vrot.lane.b32.xlu1 %v4558_v46, %s4460_s8 }
 0x163   : > { %v470_v3 = vpop.permute.xlu1 %469 }
 0x164   : > { %v468_v4 = vpop.permute.xlu0 %467  ;;  %v492_v10 = vsel %vm475_vm1, %v470_v3, 0 }
 0x165   : > { %4142 = vmatprep.subr.msk.bf16.mxu0 %vm475_vm1, %v468_v4  ;;  %v489_v5 = vsel %vm475_vm1, %v468_v4, 0 }
 0x166   : > { %3751 = vmatpush3.bf16.xpose.msra.mxu0 %v489_v5 }
 0x167   : > { %v4600_v6 = vpop.permute.xlu1 %421  ;;  %4143 = vmatprep.subr.msk.bf16.mxu0 %vm475_vm1, %v470_v3 }
 0x168   : > { %664 = vrot.lane.b32.xlu1 %v4600_v6, %s4458_s6  ;;  %v4605_v7 = vpop.permute.xlu0 %419 }
 0x169   : > { %662 = vrot.lane.b32.xlu0 %v4605_v7, %s4458_s6 }
 0x16c   : > { %445 = vrot.lane.b32.xlu1 %v4568_v55, %s4460_s8  ;;  %v472_v8 = vpop.permute.xlu0 %471  ;;  %v4611_v9 = vpop.permute.xlu1 %423 }
 0x16d   : > { %443 = vrot.lane.b32.xlu0 %v4570_v56, %s4460_s8  ;;  %v495_v14 = vsel %vm475_vm1, %v472_v8, 0 }
 0x16e   : > { %3753 = vmatpush3.bf16.xpose.msra.mxu0 %v492_v10 }
 0x16f   : > { %4144 = vmatprep.subr.msk.bf16.mxu0 %vm475_vm1, %v472_v8 }
 0x170   : > { %447 = vrot.lane.b32.xlu1 %v4582_v2, %s4460_s8  ;;  %v474_v11 = vpop.permute.xlu0 %473  ;;  %v4621_v12 = vpop.permute.xlu1 %425 }
 0x171   : > { %441 = vrot.lane.b32.xlu0 %v4556_v45, %s4460_s8  ;;  %v498_v18 = vsel %vm475_vm1, %v474_v11, 0 }
 0x174   : > { %668 = vrot.lane.b32.xlu1 %v4621_v12, %s4458_s6  ;;  %v566_v13 = vpop.permute.xlu0 %565  ;;  %v4631_v16 = vpop.permute.xlu1 %427 }
 0x175   : > { %666 = vrot.lane.b32.xlu0 %v4611_v9, %s4458_s6  ;;  %v586_v21 = vsel %vm475_vm1, %v566_v13, 0 }
 0x176   : > { %3755 = vmatpush3.bf16.xpose.msra.mxu0 %v495_v14 }
 0x177   : > { %4145 = vmatprep.subr.msk.bf16.mxu0 %vm475_vm1, %v474_v11 }
 0x178   : > { %453 = vrot.lane.b32.xlu1 %v4542_v35, %s4461_s9  ;;  %v568_v15 = vpop.permute.xlu0 %567  ;;  %v4640_v19 = vpop.permute.xlu1 %429 }
 0x179   : > { %451 = vrot.lane.b32.xlu0 %v4544_v36, %s4461_s9  ;;  %v589_v25 = vsel %vm475_vm1, %v568_v15, 0 }
 0x17c   : > { %455 = vrot.lane.b32.xlu1 %v4558_v46, %s4461_s9  ;;  %v570_v17 = vpop.permute.xlu0 %569  ;;  %v4658_v22 = vpop.permute.xlu1 %431 }
 0x17d   : > { %449 = vrot.lane.b32.xlu0 %v4580_v1, %s4460_s8  ;;  %v592_v27 = vsel %vm475_vm1, %v570_v17, 0 }
 0x17e   : > { %3757 = vmatpush3.bf16.xpose.msra.mxu0 %v498_v18 }
 0x17f   : > { %4146 = vmatprep.subr.msk.bf16.mxu0 %vm475_vm1, %v566_v13 }
 0x180   : > { %761 = vrot.lane.b32.xlu1 %v4640_v19, %s4458_s6  ;;  %v4645_v20 = vpop.permute.xlu0 %435  ;;  %v572_v24 = vpop.permute.xlu1 %571 }
 0x181   : > { %759 = vrot.lane.b32.xlu0 %v4631_v16, %s4458_s6  ;;  %3822 = vmatprep.mubr.msk.bf16.mxu1 %vm475_vm1, %v4645_v20  ;;  %v595_v29 = vsel %vm475_vm1, %v572_v24, 0 }
 0x184   : > { %461 = vrot.lane.b32.xlu1 %v4568_v55, %s4461_s9  ;;  %v4667_v23 = vpop.permute.xlu0 %433  ;;  %v4683_v26 = vpop.permute.xlu1 %437 }
 0x185   : > { %459 = vrot.lane.b32.xlu0 %v4570_v56, %s4461_s9  ;;  %3759 = vmatmul.mubr.msk.bf16.vlgmr.msra.gmra.mrb[16].mxu0 %vm475_vm1, %v4542_v35 }
 0x186   : > { %3762 = vmatprep.mubr.msk.bf16.mxu0 %vm475_vm1, %v4558_v46  ;;  %3767 = vmatpush3.bf16.xpose.msra.mxu0 %v586_v21 }
 0x187   : > { %4147 = vmatprep.subr.msk.bf16.mxu0 %vm475_vm1, %v568_v15 }
 0x188   : > { %856 = vrot.lane.b32.xlu1 %v4645_v20, %s4458_s6  ;;  %v4689_v28 = vpop.permute.xlu1 %439 }
 0x189   : > { %457 = vrot.lane.b32.xlu0 %v4556_v45, %s4461_s9 }
 0x18c   : > { %765 = vrot.lane.b32.xlu1 %v4667_v23, %s4458_s6 }
 0x18d   : > { %763 = vrot.lane.b32.xlu0 %v4658_v22, %s4458_s6  ;;  %3763 = vmatmul.mubr.msk.bf16.gmra.mrb[20].mxu0 %vm475_vm1, %v4556_v45 }
 0x18e   : > { %3769 = vmatpush3.bf16.xpose.msra.mxu0 %v589_v25  ;;  %3774 = vmatprep.mubr.msk.bf16.mxu0 %vm475_vm1, %v4570_v56 }
 0x18f   : > { %4148 = vmatprep.subr.msk.bf16.mxu0 %vm475_vm1, %v570_v17 }
 0x190   : > { %465 = vrot.lane.b32.xlu1 %v4580_v1, %s4461_s9 }
 0x191   : > { %463 = vrot.lane.b32.xlu0 %v4582_v2, %s4461_s9 }
 0x195   : > { %858 = vrot.lane.b32.xlu0 %v4683_v26, %s4458_s6 }
 0x196   : > { %3771 = vmatpush3.bf16.xpose.msra.mxu0 %v592_v27 }
 0x197   : > { %4149 = vmatprep.subr.msk.bf16.mxu0 %vm475_vm1, %v572_v24 }
 0x199   : > { %860 = vrot.lane.b32.xlu0 %v4689_v28, %s4458_s6 }
 0x19e   : > { %3773 = vmatpush3.bf16.xpose.msra.mxu0 %v595_v29 }
 0x1a5   : > { %3775 = vmatmul.mubr.msk.bf16.vlgmr.msra.gmra.mrb[24].mxu0 %vm475_vm1, %v4568_v55 }
 0x1a6   : > { %3778 = vmatprep.mubr.msk.bf16.mxu0 %vm475_vm1, %v4582_v2 }
 0x1ad   : > { %3779 = vmatmul.mubr.msk.bf16.gmra.mrb[28].mxu0 %vm475_vm1, %v4580_v1 }
 0x1ae   : > { %3790 = vmatprep.mubr.msk.bf16.mxu0 %vm475_vm1, %v4605_v7 }
 0x1da   : > { %v665_v30 = vpop.permute.xlu1 %664 }
 0x1db   : > { %v663_v31 = vpop.permute.xlu0 %662  ;;  %v686_v39 = vsel %vm475_vm1, %v665_v30, 0 }
 0x1dc   : > { %4150 = vmatprep.subr.msk.bf16.mxu0 %vm475_vm1, %v663_v31  ;;  %v683_v32 = vsel %vm475_vm1, %v663_v31, 0 }
 0x1dd   : > { %3783 = vmatpush3.bf16.xpose.msra.mxu0 %v683_v32 }
 0x1de   : > { %v4704_v33 = vpop.permute.xlu1 %445  ;;  %4151 = vmatprep.subr.msk.bf16.mxu0 %vm475_vm1, %v665_v30 }
 0x1df   : > { %v4707_v34 = vpop.permute.xlu0 %443 }
 0x1e0   : > { %953 = vrot.lane.b32.xlu1 %v4707_v34, %s4458_s6 }
 0x1e2   : > { %v4711_v37 = vpop.permute.xlu1 %447 }
 0x1e3   : > { %v4713_v38 = vpop.permute.xlu0 %441 }
 0x1e4   : > { %955 = vrot.lane.b32.xlu1 %v4704_v33, %s4458_s6  ;;  %862 = vrot.lane.b32.xlu0 %v4713_v38, %s4458_s6 }
 0x1e5   : > { %3785 = vmatpush3.bf16.xpose.msra.mxu0 %v686_v39 }
 0x1e6   : > { %v669_v40 = vpop.permute.xlu1 %668 }
 0x1e7   : > { %v667_v41 = vpop.permute.xlu0 %666  ;;  %v692_v51 = vsel %vm475_vm1, %v669_v40, 0 }
 0x1e8   : > { %4152 = vmatprep.subr.msk.bf16.mxu0 %vm475_vm1, %v667_v41  ;;  %v689_v44 = vsel %vm475_vm1, %v667_v41, 0 }
 0x1ea   : > { %v4721_v42 = vpop.permute.xlu1 %453 }
 0x1eb   : > { %v4723_v43 = vpop.permute.xlu0 %451 }
 0x1ec   : > { %1050 = vrot.lane.b32.xlu1 %v4723_v43, %s4458_s6 }
 0x1ed   : > { %3787 = vmatpush3.bf16.xpose.msra.mxu0 %v689_v44 }
 0x1ee   : > { %v4728_v47 = vpop.permute.xlu1 %455  ;;  %4153 = vmatprep.subr.msk.bf16.mxu0 %vm475_vm1, %v669_v40 }
 0x1ef   : > { %v4731_v48 = vpop.permute.xlu0 %449 }
 0x1f0   : > { %1052 = vrot.lane.b32.xlu1 %v4721_v42, %s4458_s6  ;;  %959 = vrot.lane.b32.xlu0 %v4731_v48, %s4458_s6 }
 0x1f2   : > { %v762_v49 = vpop.permute.xlu1 %761 }
 0x1f3   : > { %v760_v50 = vpop.permute.xlu0 %759  ;;  %v783_v0 = vsel %vm475_vm1, %v762_v49, 0 }
 0x1f4   : > { %1054 = vrot.lane.b32.xlu0 %v4728_v47, %s4458_s6  ;;  %v780_v59 = vsel %vm475_vm1, %v760_v50, 0 }
 0x1f5   : > { %3789 = vmatpush3.bf16.xpose.msra.mxu0 %v692_v51 }
 0x1f6   : > { %v4740_v52 = vpop.permute.xlu1 %461  ;;  %4154 = vmatprep.subr.msk.bf16.mxu0 %vm475_vm1, %v760_v50 }
 0x1f7   : > { %5913 = vst [vmem:[#allocation2_spill] sm:$0xff] %v4740_v52  ;;  %v4743_v53 = vpop.permute.xlu0 %459 }
 0x1f8   : > { %5914 = vst [vmem:[#allocation3_spill] sm:$0xff] %v4743_v53  ;;  %957 = vrot.lane.b32.xlu0 %v4711_v37, %s4458_s6  ;;  %1147 = vrot.lane.b32.xlu1 %v4743_v53, %s4458_s6 }
 0x1fa   : > { %v857_v54 = vpop.permute.xlu1 %856 }
 0x1fb   : > { %4158 = vmatprep.subr.msk.bf16.mxu1 %vm475_vm1, %v857_v54  ;;  %v4750_v57 = vpop.permute.xlu0 %457  ;;  %v877_v58 = vsel %vm475_vm1, %v857_v54, 0 }
 0x1fc   : > { %3815 = vmatpush3.bf16.xpose.msra.mxu1 %v877_v58  ;;  %1149 = vrot.lane.b32.xlu1 %v4740_v52, %s4458_s6 }
 0x1fd   : > { %1056 = vrot.lane.b32.xlu0 %v4750_v57, %s4458_s6  ;;  %3791 = vmatmul.mubr.msk.bf16.vlgmr.msra.gmra.mrb[32].mxu0 %vm475_vm1, %v4600_v6 }
 0x1fe   : > { %3794 = vmatprep.mubr.msk.bf16.mxu0 %vm475_vm1, %v4611_v9  ;;  %3799 = vmatpush3.bf16.xpose.msra.mxu0 %v780_v59  ;;  %v766_v60 = vpop.permute.xlu1 %765 }
 0x1ff   : > { %4155 = vmatprep.subr.msk.bf16.mxu0 %vm475_vm1, %v762_v49  ;;  %v764_v61 = vpop.permute.xlu0 %763 }
 0x200   : > { %v786_v4 = vsel %vm475_vm1, %v764_v61, 0 }
 0x201   : > { %1855 = vrot.lane.b32.xlu0 %v4542_v35, %s4462_s10 }
 0x202   : > { %v4765_v62 = vpop.permute.xlu1 %465 }
 0x203   : > { %5915 = vst [vmem:[#allocation4_spill] sm:$0xff] %v4765_v62  ;;  %1153 = vrot.lane.b32.xlu1 %v4765_v62, %s4458_s6  ;;  %v4769_v63 = vpop.permute.xlu0 %463 }
 0x204   : > { %5916 = vst [vmem:[#allocation5_spill] sm:$0xff] %v4769_v63 }
 0x205   : > { %1942 = vrot.lane.b32.xlu0 %v4570_v56, %s4462_s10  ;;  %3795 = vmatmul.mubr.msk.bf16.gmra.mrb[36].mxu0 %vm475_vm1, %v4621_v12 }
 0x206   : > { %3801 = vmatpush3.bf16.xpose.msra.mxu0 %v783_v0  ;;  %3806 = vmatprep.mubr.msk.bf16.mxu0 %vm475_vm1, %v4631_v16 }
 0x207   : > { %1853 = vrot.lane.b32.xlu1 %v4544_v36, %s4462_s10  ;;  %v859_v35 = vpop.permute.xlu0 %858  ;;  %4156 = vmatprep.subr.msk.bf16.mxu0 %vm475_vm1, %v764_v61 }
 0x208   : > { %4159 = vmatprep.subr.msk.bf16.mxu1 %vm475_vm1, %v859_v35  ;;  %v880_v3 = vsel %vm475_vm1, %v859_v35, 0 }
 0x209   : > { %1946 = vrot.lane.b32.xlu0 %v4582_v2, %s4462_s10  ;;  %3817 = vmatpush3.bf16.xpose.msra.mxu1 %v880_v3 }
 0x20b   : > { %1857 = vrot.lane.b32.xlu1 %v4558_v46, %s4462_s10  ;;  %v861_v56 = vpop.permute.xlu0 %860  ;;  %v789_v46 = vsel %vm475_vm1, %v766_v60, 0 }
 0x20c   : > { %4160 = vmatprep.subr.msk.bf16.mxu1 %vm475_vm1, %v861_v56  ;;  %v883_v36 = vsel %vm475_vm1, %v861_v56, 0 }
 0x20d   : > { %2031 = vrot.lane.b32.xlu0 %v4605_v7, %s4462_s10 }
 0x20e   : > { %3803 = vmatpush3.bf16.xpose.msra.mxu0 %v786_v4 }
 0x20f   : > { %1859 = vrot.lane.b32.xlu1 %v4556_v45, %s4462_s10  ;;  %4157 = vmatprep.subr.msk.bf16.mxu0 %vm475_vm1, %v766_v60 }
 0x211   : > { %2035 = vrot.lane.b32.xlu0 %v4611_v9, %s4462_s10  ;;  %3819 = vmatpush3.bf16.xpose.msra.mxu1 %v883_v36 }
 0x213   : > { %1944 = vrot.lane.b32.xlu1 %v4568_v55, %s4462_s10 }
 0x215   : > { %2120 = vrot.lane.b32.xlu0 %v4631_v16, %s4462_s10 }
 0x216   : > { %3805 = vmatpush3.bf16.xpose.msra.mxu0 %v789_v46 }
 0x217   : > { %1948 = vrot.lane.b32.xlu1 %v4580_v1, %s4462_s10 }
 0x219   : > { %1151 = vrot.lane.b32.xlu0 %v4769_v63, %s4458_s6 }
 0x21b   : > { %2033 = vrot.lane.b32.xlu1 %v4600_v6, %s4462_s10 }
 0x21d   : > { %2209 = vrot.lane.b32.xlu0 %v4645_v20, %s4462_s10  ;;  %3807 = vmatmul.mubr.msk.bf16.vlgmr.msra.gmra.mrb[40].mxu0 %vm475_vm1, %v4640_v19 }
 0x21e   : > { %3810 = vmatprep.mubr.msk.bf16.mxu0 %vm475_vm1, %v4658_v22 }
 0x21f   : > { %2037 = vrot.lane.b32.xlu1 %v4621_v12, %s4462_s10 }
 0x221   : > { %2213 = vrot.lane.b32.xlu0 %v4689_v28, %s4462_s10 }
 0x223   : > { %2122 = vrot.lane.b32.xlu1 %v4640_v19, %s4462_s10 }
 0x225   : > { %2298 = vrot.lane.b32.xlu0 %v4707_v34, %s4462_s10  ;;  %3811 = vmatmul.mubr.msk.bf16.gmra.mrb[44].mxu0 %vm475_vm1, %v4667_v23 }
 0x226   : > { %3838 = vmatprep.mubr.msk.bf16.mxu0 %vm475_vm1, %v4707_v34 }
 0x227   : > { %2126 = vrot.lane.b32.xlu1 %v4667_v23, %s4462_s10 }
 0x229   : > { %2124 = vrot.lane.b32.xlu0 %v4658_v22, %s4462_s10 }
 0x22b   : > { %2211 = vrot.lane.b32.xlu1 %v4683_v26, %s4462_s10 }
 0x22d   : > { %2302 = vrot.lane.b32.xlu0 %v4711_v37, %s4462_s10 }
 0x22f   : > { %2215 = vrot.lane.b32.xlu1 %v4713_v38, %s4462_s10 }
 0x233   : > { %2300 = vrot.lane.b32.xlu1 %v4704_v33, %s4462_s10 }
 0x252   : > { %v954_v45 = vpop.permute.xlu1 %953 }
 0x253   : > { %4162 = vmatprep.subr.msk.bf16.mxu0 %vm475_vm1, %v954_v45  ;;  %v974_v55 = vsel %vm475_vm1, %v954_v45, 0 }
 0x254   : > { %3831 = vmatpush3.bf16.xpose.msra.mxu0 %v974_v55 }
 0x256   : > { %v956_v1 = vpop.permute.xlu1 %955  ;;  %v863_v2 = vpop.permute.xlu0 %862 }
 0x257   : > { %4161 = vmatprep.subr.msk.bf16.mxu1 %vm475_vm1, %v863_v2  ;;  %4163 = vmatprep.subr.msk.bf16.mxu0 %vm475_vm1, %v956_v1  ;;  %v886_v5 = vsel %vm475_vm1, %v863_v2, 0  ;;  %v977_v11 = vsel %vm475_vm1, %v956_v1, 0 }
 0x258   : > { %v4843_v6 = vpop.f32.mrb[16].mxu0  ;;  %3821 = vmatpush3.bf16.xpose.msra.mxu1 %v886_v5 }
 0x259   : > { %v4845_v7 = vpop.f32.mrb[17].mxu0  ;;  %v1251_v8 = vsel %vm1244_vm2, %v4843_v6, -inf }
 0x25a   : > { %1252 = vmax.xlane.f32.xlu0 %v1251_v8  ;;  %v4849_v9 = vpop.f32.mrb[18].mxu0  ;;  %v1245_v13 = vsel %vm1244_vm2, %v4845_v7, -inf }
 0x25b   : > { %v4851_v10 = vpop.f32.mrb[19].mxu0  ;;  %v1254_v18 = vsel %vm1244_vm2, %v4849_v9, -inf }
 0x25c   : > { %3833 = vmatpush3.bf16.xpose.msra.mxu0 %v977_v11  ;;  %v1248_v12 = vsel %vm1244_vm2, %v4851_v10, -inf }
 0x25d   : > { %1249 = vmax.xlane.f32.xlu1 %v1248_v12 }
 0x25e   : > { %v1051_v14 = vpop.permute.xlu1 %1050  ;;  %1246 = vmax.xlane.f32.xlu0 %v1245_v13 }
 0x25f   : > { %3823 = vmatmul.mubr.msk.bf16.vlgmr.msra.gmra.mrb[0].mxu1 %vm475_vm1, %v4683_v26  ;;  %4166 = vmatprep.subr.msk.bf16.mxu1 %vm475_vm1, %v1051_v14  ;;  %v1071_v15 = vsel %vm475_vm1, %v1051_v14, 0 }
 0x260   : > { %v4862_v16 = vpop.f32.mrb[20].mxu0  ;;  %3826 = vmatprep.mubr.msk.bf16.mxu1 %vm475_vm1, %v4689_v28  ;;  %3847 = vmatpush3.bf16.xpose.msra.mxu1 %v1071_v15 }
 0x261   : > { %v4866_v17 = vpop.f32.mrb[21].mxu0  ;;  %v1263_v19 = vsel %vm1244_vm2, %v4862_v16, -inf }
 0x262   : > { %v1053_v20 = vpop.permute.xlu1 %1052  ;;  %v960_v21 = vpop.permute.xlu0 %959  ;;  %1255 = vmax.xlane.f32.xlu0 %v1254_v18  ;;  %1264 = vmax.xlane.f32.xlu1 %v1263_v19  ;;  %v1257_v24 = vsel %vm1244_vm2, %v4866_v17, -inf }
 0x263   : > { %v4872_v22 = vpop.f32.mrb[22].mxu0  ;;  %4167 = vmatprep.subr.msk.bf16.mxu1 %vm475_vm1, %v1053_v20  ;;  %v1074_v27 = vsel %vm475_vm1, %v1053_v20, 0  ;;  %v983_v40 = vsel %vm475_vm1, %v960_v21, 0 }
 0x264   : > { %v4875_v23 = vpop.f32.mrb[23].mxu0  ;;  %v1266_v25 = vsel %vm1244_vm2, %v4872_v22, -inf }
 0x265   : > { %v1260_v28 = vsel %vm1244_vm2, %v4875_v23, -inf }
 0x266   : > { %v1055_v26 = vpop.permute.xlu0 %1054  ;;  %1258 = vmax.xlane.f32.xlu1 %v1257_v24  ;;  %1267 = vmax.xlane.f32.xlu0 %v1266_v25 }
 0x267   : > { %3827 = vmatmul.mubr.msk.bf16.gmra.mrb[4].mxu1 %vm475_vm1, %v4713_v38  ;;  %v1077_v34 = vsel %vm475_vm1, %v1055_v26, 0 }
 0x268   : > { %3849 = vmatpush3.bf16.xpose.msra.mxu1 %v1074_v27  ;;  %3854 = vmatprep.mubr.msk.bf16.mxu1 %vm475_vm1, %v4723_v43 }
 0x269   : > { %4168 = vmatprep.subr.msk.bf16.mxu1 %vm475_vm1, %v1055_v26 }
 0x26a   : > { %v958_v29 = vpop.permute.xlu0 %957  ;;  %1261 = vmax.xlane.f32.xlu0 %v1260_v28  ;;  %v1148_v30 = vpop.permute.xlu1 %1147 }
 0x26b   : > { %4164 = vmatprep.subr.msk.bf16.mxu0 %vm475_vm1, %v958_v29  ;;  %v980_v31 = vsel %vm475_vm1, %v958_v29, 0  ;;  %v1168_v35 = vsel %vm475_vm1, %v1148_v30, 0 }
 0x26c   : > { %3835 = vmatpush3.bf16.xpose.msra.mxu0 %v980_v31 }
 0x26d   : > { %4165 = vmatprep.subr.msk.bf16.mxu0 %vm475_vm1, %v960_v21 }
 0x26e   : > { %v1150_v38 = vpop.permute.xlu1 %1149 }
 0x26f   : > { %v1057_v32 = vpop.permute.xlu0 %1056  ;;  %v1171_v2 = vsel %vm475_vm1, %v1150_v38, 0 }
 0x270   : > { %3851 = vmatpush3.bf16.xpose.msra.mxu1 %v1077_v34  ;;  %v1080_v49 = vsel %vm475_vm1, %v1057_v32, 0 }
 0x271   : > { %4169 = vmatprep.subr.msk.bf16.mxu1 %vm475_vm1, %v1057_v32 }
 0x273   : > { %v1856_v39 = vpop.permute.xlu0 %1855 }
 0x274   : > { %3837 = vmatpush3.bf16.xpose.msra.mxu0 %v983_v40 }
 0x275   : > { %v1154_v41 = vpop.permute.xlu1 %1153  ;;  %4170 = vmatprep.subr.msk.bf16.mxu0 %vm475_vm1, %v1148_v30 }
 0x276   : > { %v1177_v18 = vsel %vm475_vm1, %v1154_v41, 0 }
 0x277   : > { %v4896_v44 = vpop.permute.xlu0 %1942 }
 0x278   : > { %v4899_v50 = vpop.f32.mrb[24].mxu0  ;;  %3853 = vmatpush3.bf16.xpose.msra.mxu1 %v1080_v49 }
 0x279   : > { %v1854_v51 = vpop.permute.xlu1 %1853  ;;  %v4901_v54 = vpop.f32.mrb[25].mxu0  ;;  %v1275_v58 = vsel %vm1244_vm2, %v4899_v50, -inf }
 0x27a   : > { %3878 = vmatprep.subr.bf16.mxu1 %v1854_v51  ;;  %1276 = vmax.xlane.f32.xlu0 %v1275_v58  ;;  %v4905_v59 = vpop.f32.mrb[26].mxu0  ;;  %v1269_v60 = vsel %vm1244_vm2, %v4901_v54, -inf }
 0x27b   : > { %v1947_v61 = vpop.permute.xlu0 %1946  ;;  %3839 = vmatmul.mubr.msk.bf16.vlgmr.msra.gmra.mrb[48].mxu0 %vm475_vm1, %v4704_v33  ;;  %1270 = vmax.xlane.f32.xlu1 %v1269_v60  ;;  %v4911_v0 = vpop.f32.mrb[27].mxu0  ;;  %v1278_v3 = vsel %vm1244_vm2, %v4905_v59, -inf }
 0x27c   : > { %3842 = vmatprep.mubr.msk.bf16.mxu0 %vm475_vm1, %v4711_v37  ;;  %3863 = vmatpush3.bf16.xpose.msra.mxu0 %v1168_v35  ;;  %v1272_v37 = vsel %vm1244_vm2, %v4911_v0, -inf }
 0x27d   : > { %4171 = vmatprep.subr.msk.bf16.mxu0 %vm475_vm1, %v1150_v38  ;;  %v1858_v36 = vpop.permute.xlu1 %1857 }
 0x27e   : > { %1279 = vmax.xlane.f32.xlu0 %v1278_v3 }
 0x27f   : > { %v4919_v56 = vpop.permute.xlu0 %2031  ;;  %3855 = vmatmul.mubr.msk.bf16.vlgmr.msra.gmra.mrb[8].mxu1 %vm475_vm1, %v4721_v42 }
 0x280   : > { %v4923_v33 = vpop.f32.mrb[28].mxu0  ;;  %3858 = vmatprep.mubr.msk.bf16.mxu1 %vm475_vm1, %v4728_v47  ;;  %3879 = vmatpush3.bf16.msra.mxu1 %v1854_v51 }
 0x281   : > { %v4927_v4 = vpop.f32.mrb[29].mxu0  ;;  %3880 = vmatprep.subr.bf16.mxu1 %v1856_v39  ;;  %v1287_v5 = vsel %vm1244_vm2, %v4923_v33, -inf  ;;  %v1860_v11 = vpop.permute.xlu1 %1859 }
 0x282   : > { %1273 = vmax.xlane.f32.xlu0 %v1272_v37  ;;  %v4931_v46 = vpop.f32.mrb[30].mxu0  ;;  %v1281_v45 = vsel %vm1244_vm2, %v4927_v4, -inf }
 0x283   : > { %v4935_v55 = vpop.permute.xlu0 %2035  ;;  %3843 = vmatmul.mubr.msk.bf16.gmra.mrb[52].mxu0 %vm475_vm1, %v4731_v48  ;;  %1282 = vmax.xlane.f32.xlu1 %v1281_v45  ;;  %v4939_v1 = vpop.f32.mrb[31].mxu0  ;;  %v1290_v12 = vsel %vm1244_vm2, %v4931_v46, -inf }
 0x284   : > { %3865 = vmatpush3.bf16.xpose.msra.mxu0 %v1171_v2  ;;  %3870 = vmatprep.mubr.msk.bf16.mxu0 %vm475_vm1, %v4743_v53  ;;  %v1284_v15 = vsel %vm1244_vm2, %v4939_v1, -inf }
 0x285   : > { %3881 = vmatpush3.bf16.msra.mxu1 %v1856_v39  ;;  %v1945_v19 = vpop.permute.xlu1 %1944 }
 0x286   : > { %3882 = vmatprep.subr.bf16.mxu1 %v1858_v36  ;;  %1288 = vmax.xlane.f32.xlu0 %v1287_v5 }
 0x287   : > { %v4946_v8 = vpop.permute.xlu0 %2120  ;;  %3859 = vmatmul.mubr.msk.bf16.gmra.mrb[12].mxu1 %vm475_vm1, %v4750_v57 }
 0x289   : > { %3883 = vmatpush3.bf16.msra.mxu1 %v1858_v36  ;;  %v1949_v20 = vpop.permute.xlu1 %1948 }
 0x28a   : > { %3884 = vmatprep.subr.bf16.mxu1 %v1860_v11  ;;  %1291 = vmax.xlane.f32.xlu0 %v1290_v12 }
 0x28b   : > { %v1152_v13 = vpop.permute.xlu0 %1151 }
 0x28c   : > { %4172 = vmatprep.subr.msk.bf16.mxu0 %vm475_vm1, %v1152_v13  ;;  %v1174_v14 = vsel %vm475_vm1, %v1152_v13, 0 }
 0x28d   : > { %3867 = vmatpush3.bf16.xpose.msra.mxu0 %v1174_v14  ;;  %3885 = vmatpush3.bf16.msra.mxu1 %v1860_v11  ;;  %v4968_v21 = vpop.permute.xlu1 %2033 }
 0x28e   : > { %4173 = vmatprep.subr.msk.bf16.mxu0 %vm475_vm1, %v1154_v41  ;;  %3910 = vmatprep.subr.bf16.mxu1 %v4919_v56 }
 0x28f   : > { %1285 = vmax.xlane.f32.xlu0 %v1284_v15  ;;  %v4972_v25 = vpop.permute.xlu0 %2209 }
 0x291   : > { %v4970_v24 = vpop.permute.xlu1 %2037 }
 0x293   : > { %v4978_v28 = vpop.permute.xlu0 %2213 }
 0x295   : > { %3869 = vmatpush3.bf16.xpose.msra.mxu0 %v1177_v18  ;;  %v4974_v26 = vpop.permute.xlu1 %2122 }
 0x296   : > { %3894 = vmatprep.subr.bf16.mxu0 %v4896_v44 }
 0x297   : > { %v4992_v39 = vpop.permute.xlu0 %2298 }
 0x299   : > { %v4990_v38 = vpop.permute.xlu1 %2126 }
 0x29b   : > { %v5004_v58 = vpop.permute.xlu0 %2124 }
 0x29c   : > { %3871 = vmatmul.mubr.msk.bf16.vlgmr.msra.gmra.mrb[56].mxu0 %vm475_vm1, %v4740_v52 }
 0x29d   : > { %3874 = vmatprep.mubr.msk.bf16.mxu0 %vm475_vm1, %v4769_v63  ;;  %3895 = vmatpush3.bf16.msra.mxu0 %v4896_v44  ;;  %v4998_v44 = vpop.permute.xlu1 %2211 }
 0x29e   : > { %3896 = vmatprep.subr.bf16.mxu0 %v1945_v19 }
 0x2a1   : > { %3897 = vmatpush3.bf16.msra.mxu0 %v1945_v19  ;;  %v5006_v60 = vpop.permute.xlu1 %2215 }
 0x2a2   : > { %3898 = vmatprep.subr.bf16.mxu0 %v1947_v61 }
 0x2a4   : > { %3875 = vmatmul.mubr.msk.bf16.gmra.mrb[60].mxu0 %vm475_vm1, %v4765_v62 }
 0x2a5   : > { %3899 = vmatpush3.bf16.msra.mxu0 %v1947_v61  ;;  %v5008_v61 = vpop.permute.xlu0 %2302  ;;  %v5010_v35 = vpop.permute.xlu1 %2300 }
 0x2a6   : > { %3900 = vmatprep.subr.bf16.mxu0 %v1949_v20 }
 0x2a9   : > { %3901 = vmatpush3.bf16.msra.mxu0 %v1949_v20 }
 0x2aa   : > { %3926 = vmatprep.subr.bf16.mxu0 %v4946_v8 }
 0x2d0   : > { %v4976_v27 = vpop.f32.mrb[32].mxu0 }
 0x2d1   : > { %v4980_v29 = vpop.f32.mrb[33].mxu0  ;;  %v1299_v30 = vsel %vm1244_vm2, %v4976_v27, -inf }
 0x2d2   : > { %1300 = vmax.xlane.f32.xlu0 %v1299_v30  ;;  %v4984_v31 = vpop.f32.mrb[34].mxu0 }
 0x2d3   : > { %v4986_v32 = vpop.f32.mrb[35].mxu0  ;;  %v1302_v34 = vsel %vm1244_vm2, %v4984_v31, -inf }
 0x2d4   : > { %1303 = vmax.xlane.f32.xlu1 %v1302_v34 }
 0x2d8   : > { %v4994_v40 = vpop.f32.mrb[36].mxu0 }
 0x2d9   : > { %v4996_v41 = vpop.f32.mrb[37].mxu0 }
 0x2da   : > { %v5000_v49 = vpop.f32.mrb[38].mxu0 }
 0x2db   : > { %v5002_v51 = vpop.f32.mrb[39].mxu0 }
 0x2e7   : > { %v1253_v3 = vpop.xlane.xlu0 %1252 }
 0x2e8   : > { %v1439_v36 = vsub.f32 %v4843_v6, %v1253_v3 }
 0x2ea   : > { %v1250_v37 = vpop.xlane.xlu1 %1249  ;;  %v1505_v13 = vmul.f32 1.442695, %v1439_v36 }
 0x2eb   : > { %v1438_v45 = vsub.f32 %v4851_v10, %v1250_v37  ;;  %v1247_v2 = vpop.xlane.xlu0 %1246 }
 0x2ec   : > { %v1437_v5 = vsub.f32 %v4845_v7, %v1247_v2 }
 0x2ed   : > { %v1503_v11 = vmul.f32 1.442695, %v1438_v45 }
 0x2ee   : > { %v1501_v12 = vmul.f32 1.442695, %v1437_v5 }
 0x2ef   : > { %4194 = vpow2.f32 %v1503_v11  ;;  %v1256_v14 = vpop.xlane.xlu0 %1255  ;;  %v1265_v15 = vpop.xlane.xlu1 %1264 }
 0x2f0   : > { %4196 = vpow2.f32 %v1501_v12  ;;  %v1440_v18 = vsub.f32 %v4849_v9, %v1256_v14  ;;  %v1443_v19 = vsub.f32 %v4862_v16, %v1265_v15  ;;  %v5017_v20 = vpop.f32.mrb[40].mxu0 }
 0x2f1   : > { %v5019_v30 = vpop.f32.mrb[41].mxu0  ;;  %4198 = vpow2.f32 %v1505_v13 }
 0x2f2   : > { %v1507_v6 = vmul.f32 1.442695, %v1440_v18  ;;  %v5021_v10 = vpop.f32.mrb[42].mxu0  ;;  %v1513_v3 = vmul.f32 1.442695, %v1443_v19 }
 0x2f3   : > { %v5023_v7 = vpop.f32.mrb[43].mxu0  ;;  %v1259_v34 = vpop.xlane.xlu1 %1258 }
 0x2f4   : > { %4200 = vpow2.f32 %v1507_v6  ;;  %v1441_v37 = vsub.f32 %v4866_v17, %v1259_v34  ;;  %v1268_v36 = vpop.xlane.xlu0 %1267 }
 0x2f5   : > { %v1444_v9 = vsub.f32 %v4872_v22, %v1268_v36  ;;  %4202 = vpow2.f32 %v1513_v3 }
 0x2f6   : > { %v1509_v16 = vmul.f32 1.442695, %v1441_v37 }
 0x2f7   : > { %v1515_v45 = vmul.f32 1.442695, %v1444_v9 }
 0x2f8   : > { %v1262_v2 = vpop.xlane.xlu0 %1261  ;;  %v5027_v5 = vpop.f32.mrb[44].mxu0 }
 0x2f9   : > { %v5029_v11 = vpop.eup %4194  ;;  %4204 = vpow2.f32 %v1515_v45  ;;  %v1442_v12 = vsub.f32 %v4875_v23, %v1262_v2  ;;  %v5032_v13 = vpop.f32.mrb[45].mxu0 }
 0x2fa   : > { %5917 = vst [vmem:[#allocation6_spill] sm:$0xff] %v5029_v11  ;;  %v5034_v14 = vpop.eup %4196  ;;  %v5036_v15 = vpop.f32.mrb[46].mxu0  ;;  %4206 = vpow2.f32 %v1509_v16  ;;  %v1329_v62 = vsel %vm1244_vm2, %v5032_v13, -inf }
 0x2fb   : > { %5918 = vst [vmem:[#allocation7_spill] sm:$0xff] %v5034_v14  ;;  %v1511_v17 = vmul.f32 1.442695, %v1442_v12  ;;  %v5038_v18 = vpop.f32.mrb[47].mxu0  ;;  %v1821_v22 = vpack.c.bf16 %v5029_v11, %v5034_v14  ;;  %v5042_v19 = vpop.eup %4198 }
 0x2fc   : > { %5919 = vst [vmem:[#allocation8_spill] sm:$0xff] %v5042_v19 }
 0x2fd   : > { %4208 = vpow2.f32 %v1511_v17  ;;  %3886 = vmatprep.mubr.msk.bf16.mxu1 %vm1244_vm2, %v1821_v22 }
 0x2fe   : > { %v5045_v6 = vpop.eup %4200 }
 0x2ff   : > { %5920 = vst [vmem:[#allocation9_spill] sm:$0xff] %v5045_v6  ;;  %v1822_v23 = vpack.c.bf16 %v5045_v6, %v5042_v19  ;;  %v5050_v34 = vpop.eup %4202  ;;  %v1338_v6 = vsel %vm1244_vm2, %v5036_v15, -inf }
 0x300   : > { %5921 = vst [vmem:[#allocation10_spill] sm:$0xff] %v5050_v34 }
 0x301   : > { %3887 = vmatmul.mubr.msk.bf16.vlgmr.msra.gmra.mrb[16].mxu1 %vm1244_vm2, %v1822_v23 }
 0x302   : > { %3911 = vmatpush3.bf16.msra.mxu1 %v4919_v56 }
 0x303   : > { %v5053_v3 = vpop.eup %4204  ;;  %3912 = vmatprep.subr.bf16.mxu1 %v4968_v21 }
 0x304   : > { %5922 = vst [vmem:[#allocation11_spill] sm:$0xff] %v5053_v3  ;;  %v1824_v37 = vpack.c.bf16 %v5053_v3, %v5050_v34  ;;  %v5058_v36 = vpop.eup %4206  ;;  %v1335_v3 = vsel %vm1244_vm2, %v5027_v5, -inf }
 0x305   : > { %5923 = vst [vmem:[#allocation12_spill] sm:$0xff] %v5058_v36 }
 0x306   : > { %3913 = vmatpush3.bf16.msra.mxu1 %v4968_v21 }
 0x307   : > { %v5061_v9 = vpop.eup %4208  ;;  %3914 = vmatprep.subr.bf16.mxu1 %v4935_v55  ;;  %v1277_v45 = vpop.xlane.xlu0 %1276 }
 0x308   : > { %5924 = vst [vmem:[#allocation13_spill] sm:$0xff] %v5061_v9  ;;  %v1447_v16 = vsub.f32 %v4899_v50, %v1277_v45  ;;  %v1271_v2 = vpop.xlane.xlu1 %1270  ;;  %v1823_v56 = vpack.c.bf16 %v5061_v9, %v5058_v36 }
 0x309   : > { %v1445_v17 = vsub.f32 %v4901_v54, %v1271_v2 }
 0x30a   : > { %3890 = vmatprep.mubr.msk.bf16.mxu1 %vm1244_vm2, %v1823_v56  ;;  %3915 = vmatpush3.bf16.msra.mxu1 %v4935_v55  ;;  %v1521_v12 = vmul.f32 1.442695, %v1447_v16 }
 0x30b   : > { %3891 = vmatmul.mubr.msk.bf16.gmra.mrb[20].mxu1 %vm1244_vm2, %v1824_v37  ;;  %3916 = vmatprep.subr.bf16.mxu1 %v4970_v24  ;;  %v1280_v21 = vpop.xlane.xlu0 %1279  ;;  %v1517_v50 = vmul.f32 1.442695, %v1445_v17 }
 0x30c   : > { %v1448_v22 = vsub.f32 %v4905_v59, %v1280_v21  ;;  %4210 = vpow2.f32 %v1521_v12 }
 0x30e   : > { %v1523_v23 = vmul.f32 1.442695, %v1448_v22  ;;  %3917 = vmatpush3.bf16.msra.mxu1 %v4970_v24 }
 0x30f   : > { %3942 = vmatprep.subr.bf16.mxu1 %v4972_v25  ;;  %v1274_v45 = vpop.xlane.xlu0 %1273 }
 0x310   : > { %4212 = vpow2.f32 %v1523_v23  ;;  %v1446_v55 = vsub.f32 %v4911_v0, %v1274_v45  ;;  %v1283_v2 = vpop.xlane.xlu1 %1282 }
 0x311   : > { %4214 = vpow2.f32 %v1517_v50  ;;  %v1449_v21 = vsub.f32 %v4927_v4, %v1283_v2 }
 0x312   : > { %v1519_v16 = vmul.f32 1.442695, %v1446_v55 }
 0x313   : > { %v1289_v54 = vpop.xlane.xlu0 %1288  ;;  %v1525_v23 = vmul.f32 1.442695, %v1449_v21 }
 0x314   : > { %4216 = vpow2.f32 %v1519_v16  ;;  %v1451_v37 = vsub.f32 %v4923_v33, %v1289_v54 }
 0x316   : > { %v1529_v56 = vmul.f32 1.442695, %v1451_v37  ;;  %v5079_v12 = vpop.eup %4210 }
 0x317   : > { %v1292_v59 = vpop.xlane.xlu0 %1291  ;;  %5925 = vst [vmem:[#allocation14_spill] sm:$0xff] %v5079_v12 }
 0x318   : > { %v1452_v24 = vsub.f32 %v4931_v46, %v1292_v59  ;;  %4218 = vpow2.f32 %v1529_v56 }
 0x31a   : > { %v5081_v17 = vpop.eup %4212  ;;  %v1531_v22 = vmul.f32 1.442695, %v1452_v24 }
 0x31b   : > { %5926 = vst [vmem:[#allocation15_spill] sm:$0xff] %v5081_v17  ;;  %v1826_v0 = vpack.c.bf16 %v5081_v17, %v5079_v12  ;;  %v5085_v33 = vpop.eup %4214 }
 0x31c   : > { %4220 = vpow2.f32 %v1531_v22  ;;  %v1286_v50 = vpop.xlane.xlu0 %1285  ;;  %5927 = vst [vmem:[#allocation16_spill] sm:$0xff] %v5085_v33  ;;  %v1296_v22 = vsel %vm1244_vm2, %v4986_v32, -inf }
 0x31d   : > { %v1450_v45 = vsub.f32 %v4939_v1, %v1286_v50  ;;  %4222 = vpow2.f32 %v1525_v23 }
 0x31e   : > { %v5088_v55 = vpop.eup %4216 }
 0x31f   : > { %5928 = vst [vmem:[#allocation17_spill] sm:$0xff] %v5088_v55  ;;  %v1527_v4 = vmul.f32 1.442695, %v1450_v45  ;;  %v1825_v46 = vpack.c.bf16 %v5088_v55, %v5085_v33 }
 0x321   : > { %4224 = vpow2.f32 %v1527_v4  ;;  %3902 = vmatprep.mubr.msk.bf16.mxu0 %vm1244_vm2, %v1825_v46 }
 0x322   : > { %3903 = vmatmul.mubr.msk.bf16.vlgmr.msra.gmra.mrb[64].mxu0 %vm1244_vm2, %v1826_v0  ;;  %v5096_v16 = vpop.eup %4218 }
 0x323   : > { %3927 = vmatpush3.bf16.msra.mxu0 %v4946_v8  ;;  %5929 = vst [vmem:[#allocation18_spill] sm:$0xff] %v5096_v16 }
 0x324   : > { %3928 = vmatprep.subr.bf16.mxu0 %v4974_v26 }
 0x326   : > { %v5098_v54 = vpop.eup %4220 }
 0x327   : > { %5930 = vst [vmem:[#allocation19_spill] sm:$0xff] %v5098_v54  ;;  %3929 = vmatpush3.bf16.msra.mxu0 %v4974_v26  ;;  %v1828_v1 = vpack.c.bf16 %v5098_v54, %v5096_v16  ;;  %v5104_v37 = vpop.eup %4222 }
 0x328   : > { %3930 = vmatprep.subr.bf16.mxu0 %v5004_v58  ;;  %5931 = vst [vmem:[#allocation20_spill] sm:$0xff] %v5104_v37 }
 0x32b   : > { %v5106_v2 = vpop.eup %4224  ;;  %3931 = vmatpush3.bf16.msra.mxu0 %v5004_v58 }
 0x32c   : > { %5932 = vst [vmem:[#allocation21_spill] sm:$0xff] %v5106_v2  ;;  %3932 = vmatprep.subr.bf16.mxu0 %v4990_v38  ;;  %v1827_v8 = vpack.c.bf16 %v5106_v2, %v5104_v37 }
 0x32e   : > { %3906 = vmatprep.mubr.msk.bf16.mxu0 %vm1244_vm2, %v1827_v8  ;;  %v1314_v8 = vsel %vm1244_vm2, %v5000_v49, -inf }
 0x32f   : > { %3907 = vmatmul.mubr.msk.bf16.gmra.mrb[68].mxu0 %vm1244_vm2, %v1828_v1  ;;  %v1311_v1 = vsel %vm1244_vm2, %v4994_v40, -inf }
 0x330   : > { %3933 = vmatpush3.bf16.msra.mxu0 %v4990_v38  ;;  %v1293_v38 = vsel %vm1244_vm2, %v4980_v29, -inf }
 0x331   : > { %3958 = vmatprep.subr.bf16.mxu0 %v4992_v39 }
 0x332   : > { %v5116_v26 = vpop.f32.mrb[0].mxu1 }
 0x333   : > { %v5118_v56 = vpop.f32.mrb[1].mxu1  ;;  %v1347_v58 = vsel %vm1244_vm2, %v5116_v26, -inf }
 0x334   : > { %v5122_v59 = vpop.f32.mrb[2].mxu1  ;;  %1348 = vmax.xlane.f32.xlu0 %v1347_v58  ;;  %v1341_v50 = vsel %vm1244_vm2, %v5118_v56, -inf }
 0x335   : > { %v5124_v21 = vpop.f32.mrb[3].mxu1  ;;  %v1350_v24 = vsel %vm1244_vm2, %v5122_v59, -inf }
 0x336   : > { %1351 = vmax.xlane.f32.xlu1 %v1350_v24  ;;  %v1344_v46 = vsel %vm1244_vm2, %v5124_v21, -inf }
 0x338   : > { %1294 = vmax.xlane.f32.xlu0 %v1293_v38  ;;  %v1305_v38 = vsel %vm1244_vm2, %v4996_v41, -inf }
 0x33a   : > { %v5132_v0 = vpop.f32.mrb[4].mxu1  ;;  %1297 = vmax.xlane.f32.xlu1 %v1296_v22  ;;  %v1308_v22 = vsel %vm1244_vm2, %v5002_v51, -inf }
 0x33b   : > { %v5134_v23 = vpop.f32.mrb[5].mxu1  ;;  %v1359_v58 = vsel %vm1244_vm2, %v5132_v0, -inf }
 0x33c   : > { %v5138_v45 = vpop.f32.mrb[6].mxu1  ;;  %1342 = vmax.xlane.f32.xlu0 %v1341_v50  ;;  %v1353_v50 = vsel %vm1244_vm2, %v5134_v23, -inf }
 0x33d   : > { %v5140_v4 = vpop.f32.mrb[7].mxu1  ;;  %v1362_v24 = vsel %vm1244_vm2, %v5138_v45, -inf }
 0x33e   : > { %1345 = vmax.xlane.f32.xlu1 %v1344_v46  ;;  %v1356_v46 = vsel %vm1244_vm2, %v5140_v4, -inf }
 0x340   : > { %1312 = vmax.xlane.f32.xlu0 %v1311_v1 }
 0x342   : > { %1315 = vmax.xlane.f32.xlu1 %v1314_v8 }
 0x344   : > { %1360 = vmax.xlane.f32.xlu0 %v1359_v58  ;;  %v1323_v58 = vsel %vm1244_vm2, %v5017_v20, -inf }
 0x346   : > { %1363 = vmax.xlane.f32.xlu1 %v1362_v24 }
 0x348   : > { %1306 = vmax.xlane.f32.xlu0 %v1305_v38 }
 0x34a   : > { %1309 = vmax.xlane.f32.xlu1 %v1308_v22  ;;  %v1326_v22 = vsel %vm1244_vm2, %v5021_v10, -inf }
 0x34c   : > { %1354 = vmax.xlane.f32.xlu0 %v1353_v50 }
 0x34e   : > { %1357 = vmax.xlane.f32.xlu1 %v1356_v46  ;;  %v5160_v1 = vpop.f32.mrb[48].mxu0 }
 0x34f   : > { %v5162_v8 = vpop.f32.mrb[49].mxu0 }
 0x350   : > { %1324 = vmax.xlane.f32.xlu0 %v1323_v58  ;;  %v5166_v24 = vpop.f32.mrb[50].mxu0 }
 0x351   : > { %v5168_v38 = vpop.f32.mrb[51].mxu0 }
 0x352   : > { %v5172_v50 = vpop.f32.mrb[8].mxu1  ;;  %1327 = vmax.xlane.f32.xlu1 %v1326_v22  ;;  %v1317_v22 = vsel %vm1244_vm2, %v5019_v30, -inf }
 0x353   : > { %v5174_v16 = vpop.f32.mrb[9].mxu1  ;;  %v1395_v46 = vsel %vm1244_vm2, %v5172_v50, -inf }
 0x354   : > { %v5178_v37 = vpop.f32.mrb[10].mxu1  ;;  %1396 = vmax.xlane.f32.xlu0 %v1395_v46  ;;  %v1320_v46 = vsel %vm1244_vm2, %v5023_v7, -inf }
 0x355   : > { %v5180_v12 = vpop.f32.mrb[11].mxu1  ;;  %v1398_v58 = vsel %vm1244_vm2, %v5178_v37, -inf }
 0x356   : > { %1399 = vmax.xlane.f32.xlu1 %v1398_v58  ;;  %v5184_v33 = vpop.f32.mrb[52].mxu0  ;;  %v1389_v58 = vsel %vm1244_vm2, %v5174_v16, -inf }
 0x357   : > { %v5186_v54 = vpop.f32.mrb[53].mxu0 }
 0x358   : > { %5933 = vst [vmem:[#allocation22_spill] sm:$0xff] %v5186_v54  ;;  %1318 = vmax.xlane.f32.xlu0 %v1317_v22  ;;  %v5190_v34 = vpop.f32.mrb[54].mxu0  ;;  %v1392_v22 = vsel %vm1244_vm2, %v5180_v12, -inf }
 0x359   : > { %v5192_v2 = vpop.f32.mrb[55].mxu0 }
 0x35a   : > { %v5196_v36 = vpop.f32.mrb[12].mxu1  ;;  %1321 = vmax.xlane.f32.xlu1 %v1320_v46 }
 0x35b   : > { %v5198_v17 = vpop.f32.mrb[13].mxu1 }
 0x35c   : > { %v5202_v19 = vpop.f32.mrb[14].mxu1  ;;  %1390 = vmax.xlane.f32.xlu0 %v1389_v58 }
 0x35d   : > { %5934 = vst [vmem:[#allocation23_spill] sm:$0xff] %v5202_v19  ;;  %v5204_v55 = vpop.f32.mrb[15].mxu1 }
 0x35e   : > { %1393 = vmax.xlane.f32.xlu1 %v1392_v22  ;;  %v1332_v22 = vsel %vm1244_vm2, %v5038_v18, -inf }
 0x35f   : > { %v1301_v14 = vpop.xlane.xlu0 %1300 }
 0x360   : > { %v1455_v46 = vsub.f32 %v4976_v27, %v1301_v14  ;;  %1336 = vmax.xlane.f32.xlu0 %v1335_v3  ;;  %v1401_v27 = vsel %vm1244_vm2, %v5198_v17, -inf  ;;  %v1404_v14 = vsel %vm1244_vm2, %v5204_v55, -inf }
 0x361   : > { %v1304_v9 = vpop.xlane.xlu1 %1303 }
 0x362   : > { %v1537_v11 = vmul.f32 1.442695, %v1455_v46  ;;  %v1456_v58 = vsub.f32 %v4984_v31, %v1304_v9  ;;  %1339 = vmax.xlane.f32.xlu1 %v1338_v6  ;;  %v1371_v31 = vsel %vm1244_vm2, %v5160_v1, -inf  ;;  %v1365_v6 = vsel %vm1244_vm2, %v5162_v8, -inf }
 0x364   : > { %v1539_v63 = vmul.f32 1.442695, %v1456_v58  ;;  %1330 = vmax.xlane.f32.xlu0 %v1329_v62  ;;  %4226 = vpow2.f32 %v1537_v11  ;;  %v1374_v62 = vsel %vm1244_vm2, %v5166_v24, -inf }
 0x366   : > { %4228 = vpow2.f32 %v1539_v63  ;;  %1333 = vmax.xlane.f32.xlu1 %v1332_v22  ;;  %v1368_v22 = vsel %vm1244_vm2, %v5168_v38, -inf }
 0x368   : > { %1402 = vmax.xlane.f32.xlu0 %v1401_v27 }
 0x36a   : > { %1405 = vmax.xlane.f32.xlu1 %v1404_v14  ;;  %v1383_v14 = vsel %vm1244_vm2, %v5184_v33, -inf }
 0x36c   : > { %1372 = vmax.xlane.f32.xlu0 %v1371_v31  ;;  %v1386_v31 = vsel %vm1244_vm2, %v5190_v34, -inf }
 0x36e   : > { %1375 = vmax.xlane.f32.xlu1 %v1374_v62  ;;  %v5226_v11 = vpop.eup %4226 }
 0x36f   : > { %v5228_v63 = vpop.f32.mrb[56].mxu0 }
 0x370   : > { %5935 = vst [vmem:[#allocation24_spill] sm:$0xff] %v5228_v63  ;;  %v5232_v3 = vpop.eup %4228  ;;  %v5234_v9 = vpop.f32.mrb[57].mxu0  ;;  %1366 = vmax.xlane.f32.xlu0 %v1365_v6  ;;  %v1377_v6 = vsel %vm1244_vm2, %v5186_v54, -inf }
 0x371   : > { %5936 = vst [vmem:[#allocation25_spill] sm:$0xff] %v5234_v9  ;;  %v5238_v58 = vpop.f32.mrb[58].mxu0  ;;  %v1413_v54 = vsel %vm1244_vm2, %v5234_v9, -inf }
 0x372   : > { %5937 = vst [vmem:[#allocation26_spill] sm:$0xff] %v5238_v58  ;;  %v5242_v27 = vpop.f32.mrb[59].mxu0  ;;  %1369 = vmax.xlane.f32.xlu1 %v1368_v22  ;;  %v1380_v22 = vsel %vm1244_vm2, %v5192_v2, -inf }
 0x373   : > { %5938 = vst [vmem:[#allocation27_spill] sm:$0xff] %v5242_v27 }
 0x374   : > { %1384 = vmax.xlane.f32.xlu0 %v1383_v14  ;;  %v1407_v14 = vsel %vm1244_vm2, %v5196_v36, -inf }
 0x376   : > { %1387 = vmax.xlane.f32.xlu1 %v1386_v31  ;;  %v1410_v31 = vsel %vm1244_vm2, %v5202_v19, -inf }
 0x377   : > { %v5248_v62 = vpop.f32.mrb[60].mxu0 }
 0x378   : > { %v5252_v46 = vpop.f32.mrb[61].mxu0  ;;  %1378 = vmax.xlane.f32.xlu0 %v1377_v6  ;;  %v1416_v6 = vsel %vm1244_vm2, %v5242_v27, -inf }
 0x379   : > { %5939 = vst [vmem:[#allocation28_spill] sm:$0xff] %v5252_v46  ;;  %v5254_v52 = vpop.f32.mrb[62].mxu0 }
 0x37a   : > { %v5258_v53 = vpop.f32.mrb[63].mxu0  ;;  %1381 = vmax.xlane.f32.xlu1 %v1380_v22  ;;  %v1419_v22 = vsel %vm1244_vm2, %v5228_v63, -inf }
 0x37c   : > { %1408 = vmax.xlane.f32.xlu0 %v1407_v14  ;;  %v1422_v14 = vsel %vm1244_vm2, %v5238_v58, -inf }
 0x37e   : > { %1411 = vmax.xlane.f32.xlu1 %v1410_v31 }
 0x380   : > { %1414 = vmax.xlane.f32.xlu0 %v1413_v54  ;;  %v1425_v54 = vsel %vm1244_vm2, %v5252_v46, -inf }
 0x38f   : > { %2304 = vrot.lane.b32.xlu1 %v4731_v48, %s4462_s10 }
 0x396   : > { %2387 = vrot.lane.b32.xlu0 %v4723_v43, %s4462_s10 }
 0x3b3   : > { %1417 = vmax.xlane.f32.xlu1 %v1416_v6 }
 0x3b5   : > { %1420 = vmax.xlane.f32.xlu0 %v1419_v22 }
 0x3b7   : > { %1423 = vmax.xlane.f32.xlu1 %v1422_v14 }
 0x3b9   : > { %1426 = vmax.xlane.f32.xlu0 %v1425_v54 }
 0x3c1   : > { %v1349_v48 = vpop.xlane.xlu0 %1348 }
 0x3c2   : > { %v1471_v31 = vsub.f32 %v5116_v26, %v1349_v48 }
 0x3c3   : > { %v1352_v43 = vpop.xlane.xlu1 %1351 }
 0x3c4   : > { %v1569_v9 = vmul.f32 1.442695, %v1471_v31  ;;  %v1472_v27 = vsub.f32 %v5122_v59, %v1352_v43 }
 0x3c5   : > { %v1295_v6 = vpop.xlane.xlu0 %1294 }
 0x3c6   : > { %v1571_v19 = vmul.f32 1.442695, %v1472_v27  ;;  %v1453_v63 = vsub.f32 %v4980_v29, %v1295_v6  ;;  %4230 = vpow2.f32 %v1569_v9 }
 0x3c7   : > { %v1298_v22 = vpop.xlane.xlu1 %1297 }
 0x3c8   : > { %4232 = vpow2.f32 %v1571_v19  ;;  %v1533_v58 = vmul.f32 1.442695, %v1453_v63  ;;  %v1454_v14 = vsub.f32 %v4986_v32, %v1298_v22  ;;  %2389 = vrot.lane.b32.xlu1 %v4721_v42, %s4462_s10 }
 0x3c9   : > { %v1343_v54 = vpop.xlane.xlu0 %1342 }
 0x3ca   : > { %v1535_v46 = vmul.f32 1.442695, %v1454_v14  ;;  %v1469_v26 = vsub.f32 %v5118_v56, %v1343_v54  ;;  %4234 = vpow2.f32 %v1533_v58 }
 0x3cb   : > { %v1346_v48 = vpop.xlane.xlu1 %1345 }
 0x3cc   : > { %4236 = vpow2.f32 %v1535_v46  ;;  %v1565_v59 = vmul.f32 1.442695, %v1469_v26  ;;  %v1470_v27 = vsub.f32 %v5124_v21, %v1346_v48 }
 0x3cd   : > { %v1313_v29 = vpop.xlane.xlu0 %1312 }
 0x3ce   : > { %v1567_v9 = vmul.f32 1.442695, %v1470_v27  ;;  %v1459_v19 = vsub.f32 %v4994_v40, %v1313_v29  ;;  %4238 = vpow2.f32 %v1565_v59 }
 0x3cf   : > { %v1316_v63 = vpop.xlane.xlu1 %1315  ;;  %2391 = vrot.lane.b32.xlu0 %v4728_v47, %s4462_s10 }
 0x3d0   : > { %4240 = vpow2.f32 %v1567_v9  ;;  %v1545_v42 = vmul.f32 1.442695, %v1459_v19  ;;  %v1460_v32 = vsub.f32 %v5000_v49, %v1316_v63  ;;  %v5290_v56 = vpop.eup %4230 }
 0x3d1   : > { %v1361_v58 = vpop.xlane.xlu0 %1360 }
 0x3d2   : > { %v5292_v46 = vpop.eup %4232  ;;  %v1547_v31 = vmul.f32 1.442695, %v1460_v32  ;;  %v1475_v21 = vsub.f32 %v5132_v0, %v1361_v58  ;;  %4242 = vpow2.f32 %v1545_v42 }
 0x3d3   : > { %v1838_v40 = vpack.c.bf16 %v5292_v46, %v5290_v56  ;;  %v1364_v43 = vpop.xlane.xlu1 %1363 }
 0x3d4   : > { %4244 = vpow2.f32 %v1547_v31  ;;  %v1577_v6 = vmul.f32 1.442695, %v1475_v21  ;;  %v1476_v47 = vsub.f32 %v5138_v45, %v1364_v43  ;;  %v5298_v22 = vpop.f32.mrb[16].mxu1  ;;  %v5300_v49 = vpop.eup %4234  ;;  %v5940_v31 = vpack.c.bf16 %v5232_v3, %v5226_v11 }
 0x3d5   : > { %v5302_v14 = vpop.f32.mrb[17].mxu1  ;;  %v1307_v54 = vpop.xlane.xlu0 %1306 }
 0x3d6   : > { %v5304_v26 = vpop.eup %4236  ;;  %v1579_v48 = vmul.f32 1.442695, %v1476_v47  ;;  %v1457_v0 = vsub.f32 %v4996_v41, %v1307_v54  ;;  %v5307_v59 = vpop.f32.mrb[18].mxu1  ;;  %4246 = vpow2.f32 %v1577_v6 }
 0x3d7   : > { %v5309_v27 = vpop.f32.mrb[19].mxu1  ;;  %v1310_v29 = vpop.xlane.xlu1 %1309  ;;  %v1829_v45 = vpack.c.bf16 %v5304_v26, %v5300_v49 }
 0x3d8   : > { %4248 = vpow2.f32 %v1579_v48  ;;  %v1541_v9 = vmul.f32 1.442695, %v1457_v0  ;;  %v1458_v19 = vsub.f32 %v5002_v51, %v1310_v29  ;;  %v5314_v63 = vpop.eup %4238 }
 0x3d9   : > { %3918 = vmatprep.mubr.msk.bf16.mxu1 %vm1244_vm2, %v1829_v45  ;;  %v1355_v42 = vpop.xlane.xlu0 %1354 }
 0x3da   : > { %v5317_v32 = vpop.eup %4240  ;;  %v1543_v41 = vmul.f32 1.442695, %v1458_v19  ;;  %v1473_v58 = vsub.f32 %v5134_v23, %v1355_v42  ;;  %3919 = vmatmul.mubr.msk.bf16.vlgmr.msra.gmra.mrb[24].mxu1 %vm1244_vm2, %v5940_v31  ;;  %4250 = vpow2.f32 %v1541_v9 }
 0x3db   : > { %3943 = vmatpush3.bf16.msra.mxu1 %v4972_v25  ;;  %v1358_v21 = vpop.xlane.xlu1 %1357  ;;  %v1837_v51 = vpack.c.bf16 %v5317_v32, %v5314_v63 }
 0x3dc   : > { %4252 = vpow2.f32 %v1543_v41  ;;  %v1573_v43 = vmul.f32 1.442695, %v1473_v58  ;;  %3944 = vmatprep.subr.bf16.mxu1 %v4998_v44  ;;  %v1474_v6 = vsub.f32 %v5140_v4, %v1358_v21  ;;  %v5329_v47 = vpop.eup %4242 }
 0x3dd   : > { %v1325_v23 = vpop.xlane.xlu0 %1324 }
 0x3de   : > { %v5331_v54 = vpop.eup %4244  ;;  %v1575_v48 = vmul.f32 1.442695, %v1474_v6  ;;  %v5333_v0 = vpop.f32.mrb[20].mxu1  ;;  %v1463_v25 = vsub.f32 %v5017_v20, %v1325_v23  ;;  %4254 = vpow2.f32 %v1573_v43 }
 0x3df   : > { %5941 = vst [vmem:[#allocation29_spill] sm:$0xff] %v5333_v0  ;;  %v5336_v29 = vpop.f32.mrb[21].mxu1  ;;  %3945 = vmatpush3.bf16.msra.mxu1 %v4998_v44  ;;  %v1328_v45 = vpop.xlane.xlu1 %1327  ;;  %v1832_v9 = vpack.c.bf16 %v5331_v54, %v5329_v47 }
 0x3e0   : > { %4256 = vpow2.f32 %v1575_v48  ;;  %v1553_v4 = vmul.f32 1.442695, %v1463_v25  ;;  %v5341_v19 = vpop.f32.mrb[22].mxu1  ;;  %3946 = vmatprep.subr.bf16.mxu1 %v4978_v28  ;;  %v1464_v42 = vsub.f32 %v5021_v10, %v1328_v45  ;;  %v5345_v41 = vpop.eup %4246 }
 0x3e1   : > { %5942 = vst [vmem:[#allocation30_spill] sm:$0xff] %v5341_v19  ;;  %v5347_v20 = vpop.f32.mrb[23].mxu1  ;;  %v1397_v58 = vpop.xlane.xlu0 %1396  ;;  %v5971_v19 = vld [vmem:[#allocation16_spill] sm:$0xff] }
 0x3e2   : > { %5943 = vst [vmem:[#allocation31_spill] sm:$0xff] %v5347_v20  ;;  %v5349_v31 = vpop.eup %4248  ;;  %v1555_v44 = vmul.f32 1.442695, %v1464_v42  ;;  %v1487_v21 = vsub.f32 %v5172_v50, %v1397_v58  ;;  %4258 = vpow2.f32 %v1553_v4  ;;  %v5975_v20 = vld [vmem:[#allocation26_spill] sm:$0xff] }
 0x3e3   : > { %3947 = vmatpush3.bf16.msra.mxu1 %v4978_v28  ;;  %v1400_v43 = vpop.xlane.xlu1 %1399  ;;  %v1840_v6 = vpack.c.bf16 %v5349_v31, %v5345_v41 }
 0x3e4   : > { %4260 = vpow2.f32 %v1555_v44  ;;  %v1601_v23 = vmul.f32 1.442695, %v1487_v21  ;;  %3948 = vmatprep.subr.bf16.mxu1 %v5006_v60  ;;  %v1488_v10 = vsub.f32 %v5178_v37, %v1400_v43  ;;  %v5357_v48 = vpop.eup %4250 }
 0x3e5   : > { %v1319_v25 = vpop.xlane.xlu0 %1318 }
 0x3e6   : > { %v5359_v45 = vpop.eup %4252  ;;  %v1603_v42 = vmul.f32 1.442695, %v1488_v10  ;;  %v1461_v50 = vsub.f32 %v5019_v30, %v1319_v25  ;;  %4262 = vpow2.f32 %v1601_v23  ;;  %v1428_v23 = vsel %vm1244_vm2, %v5258_v53, -inf }
 0x3e7   : > { %3949 = vmatpush3.bf16.msra.mxu1 %v5006_v60  ;;  %v1322_v28 = vpop.xlane.xlu1 %1321  ;;  %v1831_v4 = vpack.c.bf16 %v5359_v45, %v5357_v48 }
 0x3e8   : > { %4264 = vpow2.f32 %v1603_v42  ;;  %v1549_v58 = vmul.f32 1.442695, %v1461_v50  ;;  %v1462_v44 = vsub.f32 %v5023_v7, %v1322_v28  ;;  %v5366_v37 = vpop.eup %4254 }
 0x3e9   : > { %3922 = vmatprep.mubr.msk.bf16.mxu1 %vm1244_vm2, %v1831_v4  ;;  %v1391_v21 = vpop.xlane.xlu0 %1390 }
 0x3ea   : > { %v5369_v43 = vpop.eup %4256  ;;  %v1551_v10 = vmul.f32 1.442695, %v1462_v44  ;;  %v1485_v30 = vsub.f32 %v5174_v16, %v1391_v21  ;;  %3923 = vmatmul.mubr.msk.bf16.gmra.mrb[28].mxu1 %vm1244_vm2, %v1832_v9  ;;  %4266 = vpow2.f32 %v1549_v58  ;;  %v1431_v9 = vsel %vm1244_vm2, %v5248_v62, -inf }
 0x3eb   : > { %3950 = vmatprep.mubr.msk.bf16.mxu1 %vm1244_vm2, %v1837_v51  ;;  %v1394_v60 = vpop.xlane.xlu1 %1393  ;;  %v1839_v7 = vpack.c.bf16 %v5369_v43, %v5366_v37 }
 0x3ec   : > { %4268 = vpow2.f32 %v1551_v10  ;;  %v1597_v25 = vmul.f32 1.442695, %v1485_v30  ;;  %v1486_v42 = vsub.f32 %v5180_v12, %v1394_v60  ;;  %1429 = vmax.xlane.f32.xlu1 %v1428_v23  ;;  %v5379_v50 = vpop.eup %4258  ;;  %v1434_v12 = vsel %vm1244_vm2, %v5254_v52, -inf }
 0x3ed   : > { %v1337_v16 = vpop.xlane.xlu0 %1336 }
 0x3ee   : > { %v5383_v28 = vpop.eup %4260  ;;  %v1599_v51 = vmul.f32 1.442695, %v1486_v42  ;;  %v1467_v4 = vsub.f32 %v5027_v5, %v1337_v16  ;;  %1432 = vmax.xlane.f32.xlu0 %v1431_v9  ;;  %4270 = vpow2.f32 %v1597_v25 }
 0x3ef   : > { %v1834_v58 = vpack.c.bf16 %v5383_v28, %v5379_v50  ;;  %v1340_v44 = vpop.xlane.xlu1 %1339 }
 0x3f0   : > { %4272 = vpow2.f32 %v1599_v51  ;;  %v1561_v21 = vmul.f32 1.442695, %v1467_v4  ;;  %v1468_v10 = vsub.f32 %v5036_v15, %v1340_v44  ;;  %1435 = vmax.xlane.f32.xlu1 %v1434_v12  ;;  %v5391_v30 = vpop.eup %4262 }
 0x3f1   : > { %v1331_v60 = vpop.xlane.xlu0 %1330 }
 0x3f2   : > { %v5393_v23 = vpop.eup %4264  ;;  %v1563_v5 = vmul.f32 1.442695, %v1468_v10  ;;  %v1465_v42 = vsub.f32 %v5032_v13, %v1331_v60  ;;  %3951 = vmatmul.mubr.msk.bf16.vlgmr.msra.gmra.mrb[32].mxu1 %vm1244_vm2, %v1838_v40  ;;  %4274 = vpow2.f32 %v1561_v21 }
 0x3f3   : > { %3954 = vmatprep.mubr.msk.bf16.mxu1 %vm1244_vm2, %v1839_v7  ;;  %v1334_v15 = vpop.xlane.xlu1 %1333 }
 0x3f4   : > { %4276 = vpow2.f32 %v1563_v5  ;;  %v1557_v16 = vmul.f32 1.442695, %v1465_v42  ;;  %v1466_v9 = vsub.f32 %v5038_v18, %v1334_v15  ;;  %v5404_v51 = vpop.eup %4266 }
 0x3f5   : > { %v1403_v4 = vpop.xlane.xlu0 %1402  ;;  %v5406_v13 = vpop.f32.mrb[64].mxu0 }
 0x3f6   : > { %5944 = vst [vmem:[#allocation32_spill] sm:$0xff] %v5406_v13  ;;  %v5408_v44 = vpop.eup %4268  ;;  %v1559_v12 = vmul.f32 1.442695, %v1466_v9  ;;  %v1489_v40 = vsub.f32 %v5198_v17, %v1403_v4  ;;  %v5411_v10 = vpop.f32.mrb[65].mxu0  ;;  %4278 = vpow2.f32 %v1557_v16 }
 0x3f7   : > { %5945 = vst [vmem:[#allocation33_spill] sm:$0xff] %v5411_v10  ;;  %v1406_v21 = vpop.xlane.xlu1 %1405  ;;  %v5413_v7 = vpop.f32.mrb[66].mxu0  ;;  %v1833_v60 = vpack.c.bf16 %v5408_v44, %v5404_v51 }
 0x3f8   : > { %5946 = vst [vmem:[#allocation34_spill] sm:$0xff] %v5413_v7  ;;  %4280 = vpow2.f32 %v1559_v12  ;;  %v1605_v18 = vmul.f32 1.442695, %v1489_v40  ;;  %v1490_v5 = vsub.f32 %v5204_v55, %v1406_v21  ;;  %v5418_v42 = vpop.f32.mrb[67].mxu0  ;;  %v5420_v15 = vpop.eup %4270 }
 0x3f9   : > { %5947 = vst [vmem:[#allocation35_spill] sm:$0xff] %v5418_v42  ;;  %3934 = vmatprep.mubr.msk.bf16.mxu0 %vm1244_vm2, %v1833_v60  ;;  %v1373_v17 = vpop.xlane.xlu0 %1372  ;;  %v5962_v42 = vld [vmem:[#allocation7_spill] sm:$0xff] }
 0x3fa   : > { %v5423_v9 = vpop.eup %4272  ;;  %v1607_v16 = vmul.f32 1.442695, %v1490_v5  ;;  %v1479_v4 = vsub.f32 %v5160_v1, %v1373_v17  ;;  %3935 = vmatmul.mubr.msk.bf16.vlgmr.msra.gmra.mrb[72].mxu0 %vm1244_vm2, %v1834_v58  ;;  %3955 = vmatmul.mubr.msk.bf16.gmra.mrb[36].mxu1 %vm1244_vm2, %v1840_v6  ;;  %4282 = vpow2.f32 %v1605_v18 }
 0x3fb   : > { %3959 = vmatpush3.bf16.msra.mxu0 %v4992_v39  ;;  %v1376_v55 = vpop.xlane.xlu1 %1375  ;;  %v1845_v12 = vpack.c.bf16 %v5423_v9, %v5420_v15 }
 0x3fc   : > { %4284 = vpow2.f32 %v1607_v16  ;;  %v1585_v40 = vmul.f32 1.442695, %v1479_v4  ;;  %3960 = vmatprep.subr.bf16.mxu0 %v5010_v35  ;;  %v1480_v1 = vsub.f32 %v5166_v24, %v1376_v55  ;;  %v5436_v21 = vpop.eup %4274 }
 0x3fd   : > { %3982 = vmatprep.mubr.msk.bf16.mxu1 %vm1244_vm2, %v1845_v12  ;;  %v1367_v58 = vpop.xlane.xlu0 %1366 }
 0x3fe   : > { %v5439_v60 = vpop.eup %4276  ;;  %v1587_v6 = vmul.f32 1.442695, %v1480_v1  ;;  %v1477_v39 = vsub.f32 %v5162_v8, %v1367_v58  ;;  %4286 = vpow2.f32 %v1585_v40 }
 0x3ff   : > { %3961 = vmatpush3.bf16.msra.mxu0 %v5010_v35  ;;  %v1370_v18 = vpop.xlane.xlu1 %1369  ;;  %v1836_v5 = vpack.c.bf16 %v5439_v60, %v5436_v21 }
 0x400   : > { %4288 = vpow2.f32 %v1587_v6  ;;  %v1581_v17 = vmul.f32 1.442695, %v1477_v39  ;;  %3962 = vmatprep.subr.bf16.mxu0 %v5008_v61  ;;  %v1478_v24 = vsub.f32 %v5168_v38, %v1370_v18  ;;  %v5447_v16 = vpop.eup %4278  ;;  %v5951_v39 = vld [vmem:[#allocation3_spill] sm:$0xff] }
 0x401   : > { %v1385_v4 = vpop.xlane.xlu0 %1384  ;;  %2393 = vrot.lane.b32.xlu1 %v4750_v57, %s4462_s10 }
 0x402   : > { %v5451_v8 = vpop.eup %4280  ;;  %v1583_v55 = vmul.f32 1.442695, %v1478_v24  ;;  %v1483_v35 = vsub.f32 %v5184_v33, %v1385_v4  ;;  %v5454_v12 = vpop.f32.mrb[68].mxu0  ;;  %4290 = vpow2.f32 %v1581_v17  ;;  %v5953_v17 = vld [vmem:[#allocation2_spill] sm:$0xff] }
 0x403   : > { %5948 = vst [vmem:[#allocation36_spill] sm:$0xff] %v5454_v12  ;;  %v5456_v40 = vpop.f32.mrb[69].mxu0  ;;  %3963 = vmatpush3.bf16.msra.mxu0 %v5008_v61  ;;  %v1388_v1 = vpop.xlane.xlu1 %1387  ;;  %v1835_v38 = vpack.c.bf16 %v5451_v8, %v5447_v16  ;;  %v5957_v12 = vld [vmem:[#allocation4_spill] sm:$0xff] }
 0x404   : > { %5949 = vst [vmem:[#allocation37_spill] sm:$0xff] %v5456_v40  ;;  %4292 = vpow2.f32 %v1583_v55  ;;  %v1593_v58 = vmul.f32 1.442695, %v1483_v35  ;;  %v1484_v57 = vsub.f32 %v5190_v34, %v1388_v1  ;;  %v5462_v6 = vpop.f32.mrb[70].mxu0  ;;  %2476 = vrot.lane.b32.xlu0 %v5951_v39, %s4462_s10  ;;  %v5466_v33 = vpop.eup %4282  ;;  %v5954_v55 = vld [vmem:[#allocation22_spill] sm:$0xff]  ;;  %v5960_v40 = vld [vmem:[#allocation13_spill] sm:$0xff] }
 0x405   : > { %5950 = vst [vmem:[#allocation38_spill] sm:$0xff] %v5462_v6  ;;  %v5468_v18 = vpop.f32.mrb[71].mxu0  ;;  %3938 = vmatprep.mubr.msk.bf16.mxu0 %vm1244_vm2, %v1835_v38  ;;  %v1379_v61 = vpop.xlane.xlu0 %1378  ;;  %2478 = vrot.lane.b32.xlu1 %v5953_v17, %s4462_s10  ;;  %v5955_v17 = vld [vmem:[#allocation5_spill] sm:$0xff]  ;;  %v1644_v7 = vsel %vm1244_vm2, %v5960_v40, 0.0 }
 0x406   : > { %5952 = vst [vmem:[#allocation3_spill] sm:$0xff] %v5468_v18  ;;  %v5473_v24 = vpop.eup %4284  ;;  %v1595_v4 = vmul.f32 1.442695, %v1484_v57  ;;  %v1481_v34 = vsub.f32 %v5954_v55, %v1379_v61  ;;  %3939 = vmatmul.mubr.msk.bf16.gmra.mrb[76].mxu0 %vm1244_vm2, %v1836_v5  ;;  %4294 = vpow2.f32 %v1593_v58 }
 0x407   : > { %v1382_v35 = vpop.xlane.xlu1 %1381 }
 0x408   : > { %4296 = vpow2.f32 %v1595_v4  ;;  %v1589_v39 = vmul.f32 1.442695, %v1481_v34  ;;  %v1482_v38 = vsub.f32 %v5192_v2, %v1382_v35  ;;  %v5480_v25 = vpop.eup %4286  ;;  %v5956_v34 = vld [vmem:[#allocation23_spill] sm:$0xff] }
 0x409   : > { %v1409_v6 = vpop.xlane.xlu0 %1408  ;;  %2480 = vrot.lane.b32.xlu1 %v5955_v17, %s4462_s10 }
 0x40a   : > { %v5484_v57 = vpop.eup %4288  ;;  %v1591_v61 = vmul.f32 1.442695, %v1482_v38  ;;  %v1491_v5 = vsub.f32 %v5196_v36, %v1409_v6  ;;  %4298 = vpow2.f32 %v1589_v39 }
 0x40b   : > { %v1842_v58 = vpack.c.bf16 %v5484_v57, %v5480_v25  ;;  %v1412_v55 = vpop.xlane.xlu1 %1411 }
 0x40c   : > { %4300 = vpow2.f32 %v1591_v61  ;;  %v1609_v4 = vmul.f32 1.442695, %v1491_v5  ;;  %v1492_v2 = vsub.f32 %v5956_v34, %v1412_v55  ;;  %v5490_v35 = vpop.eup %4290 }
 0x40d   : > { %v1415_v1 = vpop.xlane.xlu0 %1414  ;;  %2482 = vrot.lane.b32.xlu1 %v5957_v12, %s4462_s10 }
 0x40e   : > { %v5494_v17 = vpop.eup %4292  ;;  %v1611_v38 = vmul.f32 1.442695, %v1492_v2  ;;  %4302 = vpow2.f32 %v1609_v4 }
 0x40f   : > { %v2305_v36 = vpop.permute.xlu1 %2304  ;;  %v1841_v6 = vpack.c.bf16 %v5494_v17, %v5490_v35 }
 0x410   : > { %4304 = vpow2.f32 %v1611_v38  ;;  %3964 = vmatprep.subr.bf16.mxu0 %v2305_v36  ;;  %v5498_v39 = vpop.eup %4294 }
 0x411   : > { %3965 = vmatpush3.bf16.msra.mxu0 %v2305_v36  ;;  %3966 = vmatprep.mubr.msk.bf16.mxu0 %vm1244_vm2, %v1841_v6  ;;  %v2388_v61 = vpop.permute.xlu0 %2387  ;;  %v5958_v6 = vld [vmem:[#allocation6_spill] sm:$0xff]  ;;  %v1629_v36 = vsel %vm1244_vm2, %v5962_v42, 0.0 }
 0x412   : > { %v5501_v5 = vpop.eup %4296  ;;  %3974 = vmatprep.subr.bf16.mxu1 %v2388_v61 }
 0x413   : > { %3975 = vmatpush3.bf16.msra.mxu1 %v2388_v61  ;;  %v1844_v12 = vpack.c.bf16 %v5501_v5, %v5498_v39  ;;  %v5959_v61 = vld [vmem:[#allocation9_spill] sm:$0xff] }
 0x414   : > { %3967 = vmatmul.mubr.msk.bf16.vlgmr.msra.gmra.mrb[80].mxu0 %vm1244_vm2, %v1842_v58  ;;  %v5506_v55 = vpop.eup %4298  ;;  %v1632_v58 = vsel %vm1244_vm2, %v5958_v6, 0.0  ;;  %v1638_v18 = vsel %vm1244_vm2, %v5959_v61, 0.0 }
 0x416   : > { %v5508_v4 = vpop.eup %4300 }
 0x417   : > { %v1843_v34 = vpack.c.bf16 %v5508_v4, %v5506_v55 }
 0x418   : > { %v5512_v2 = vpop.eup %4302 }
 0x419   : > { %3970 = vmatprep.mubr.msk.bf16.mxu0 %vm1244_vm2, %v1843_v34  ;;  %v5961_v34 = vld [vmem:[#allocation11_spill] sm:$0xff] }
 0x41a   : > { %v5515_v38 = vpop.eup %4304  ;;  %v1650_v13 = vsel %vm1244_vm2, %v5961_v34, 0.0 }
 0x41c   : > { %3971 = vmatmul.mubr.msk.bf16.gmra.mrb[84].mxu0 %vm1244_vm2, %v1844_v12  ;;  %v5963_v12 = vld [vmem:[#allocation17_spill] sm:$0xff] }
 0x41d   : > { %v1656_v6 = vsel %vm1244_vm2, %v5963_v12, 0.0  ;;  %v5969_v12 = vld [vmem:[#allocation10_spill] sm:$0xff] }
 0x423   : > { %1633 = vadd.xlane.f32.xlu0 %v1632_v58  ;;  %v5964_v58 = vld [vmem:[#allocation8_spill] sm:$0xff] }
 0x424   : > { %v1635_v61 = vsel %vm1244_vm2, %v5964_v58, 0.0  ;;  %v5970_v58 = vld [vmem:[#allocation19_spill] sm:$0xff] }
 0x427   : > { %1639 = vadd.xlane.f32.xlu0 %v1638_v18  ;;  %v5965_v18 = vld [vmem:[#allocation15_spill] sm:$0xff] }
 0x428   : > { %v1662_v40 = vsel %vm1244_vm2, %v5965_v18, 0.0 }
 0x42b   : > { %1645 = vadd.xlane.f32.xlu0 %v1644_v7  ;;  %v5966_v7 = vld [vmem:[#allocation12_spill] sm:$0xff] }
 0x42c   : > { %v1641_v34 = vsel %vm1244_vm2, %v5966_v7, 0.0  ;;  %v1653_v7 = vsel %vm1244_vm2, %v5971_v19, 0.0 }
 0x42f   : > { %1651 = vadd.xlane.f32.xlu0 %v1650_v13  ;;  %v5967_v13 = vld [vmem:[#allocation21_spill] sm:$0xff] }
 0x430   : > { %v1668_v42 = vsel %vm1244_vm2, %v5967_v13, 0.0 }
 0x431   : > { %1630 = vadd.xlane.f32.xlu1 %v1629_v36  ;;  %v5968_v36 = vld [vmem:[#allocation25_spill] sm:$0xff] }
 0x432   : > { %v1493_v10 = vsub.f32 %v5968_v36, %v1415_v1  ;;  %v1680_v1 = vsel %vm1244_vm2, %v5304_v26, 0.0  ;;  %v5973_v36 = vld [vmem:[#allocation24_spill] sm:$0xff] }
 0x433   : > { %1657 = vadd.xlane.f32.xlu0 %v1656_v6  ;;  %v1647_v6 = vsel %vm1244_vm2, %v5969_v12, 0.0 }
 0x434   : > { %v1613_v18 = vmul.f32 1.442695, %v1493_v10 }
 0x435   : > { %1636 = vadd.xlane.f32.xlu1 %v1635_v61  ;;  %v1674_v61 = vsel %vm1244_vm2, %v5970_v58, 0.0  ;;  %v5974_v58 = vld [vmem:[#allocation14_spill] sm:$0xff] }
 0x436   : > { %4306 = vpow2.f32 %v1613_v18  ;;  %v1659_v10 = vsel %vm1244_vm2, %v5974_v58, 0.0 }
 0x437   : > { %1663 = vadd.xlane.f32.xlu0 %v1662_v40 }
 0x439   : > { %1642 = vadd.xlane.f32.xlu1 %v1641_v34  ;;  %v5972_v34 = vld [vmem:[#allocation27_spill] sm:$0xff] }
 0x43b   : > { %1669 = vadd.xlane.f32.xlu0 %v1668_v42 }
 0x43d   : > { %1648 = vadd.xlane.f32.xlu1 %v1647_v6 }
 0x43f   : > { %1675 = vadd.xlane.f32.xlu0 %v1674_v61 }
 0x440   : > { %v1418_v40 = vpop.xlane.xlu1 %1417 }
 0x441   : > { %v1494_v0 = vsub.f32 %v5972_v34, %v1418_v40  ;;  %1654 = vadd.xlane.f32.xlu1 %v1653_v7  ;;  %v1686_v7 = vsel %vm1244_vm2, %v5232_v3, 0.0  ;;  %v5976_v34 = vld [vmem:[#allocation20_spill] sm:$0xff] }
 0x442   : > { %v1421_v13 = vpop.xlane.xlu0 %1420  ;;  %v1665_v18 = vsel %vm1244_vm2, %v5976_v34, 0.0 }
 0x443   : > { %v1615_v42 = vmul.f32 1.442695, %v1494_v0  ;;  %v1495_v12 = vsub.f32 %v5973_v36, %v1421_v13  ;;  %1681 = vadd.xlane.f32.xlu0 %v1680_v1  ;;  %v5977_v1 = vld [vmem:[#allocation18_spill] sm:$0xff]  ;;  %v1698_v36 = vsel %vm1244_vm2, %v5331_v54, 0.0 }
 0x444   : > { %v1424_v6 = vpop.xlane.xlu1 %1423  ;;  %v1671_v3 = vsel %vm1244_vm2, %v5977_v1, 0.0 }
 0x445   : > { %4308 = vpow2.f32 %v1615_v42  ;;  %v1617_v61 = vmul.f32 1.442695, %v1495_v12  ;;  %v1496_v19 = vsub.f32 %v5975_v20, %v1424_v6  ;;  %1660 = vadd.xlane.f32.xlu1 %v1659_v10  ;;  %v1692_v20 = vsel %vm1244_vm2, %v5359_v45, 0.0  ;;  %v5564_v42 = vpop.eup %4306 }
 0x446   : > { %v5554_v40 = vpop.xlane.xlu0 %1426  ;;  %v1677_v6 = vsel %vm1244_vm2, %v5300_v49, 0.0  ;;  %v1704_v10 = vsel %vm1244_vm2, %v5408_v44, 0.0  ;;  %v1683_v49 = vsel %vm1244_vm2, %v5226_v11, 0.0  ;;  %v1716_v44 = vsel %vm1244_vm2, %v5451_v8, 0.0 }
 0x447   : > { %v1619_v26 = vmul.f32 1.442695, %v1496_v19  ;;  %1687 = vadd.xlane.f32.xlu0 %v1686_v7  ;;  %4310 = vpow2.f32 %v1617_v61  ;;  %v1710_v19 = vsel %vm1244_vm2, %v5383_v28, 0.0  ;;  %v1689_v7 = vsel %vm1244_vm2, %v5357_v48, 0.0 }
 0x448   : > { %v2390_v0 = vpop.permute.xlu1 %2389  ;;  %v1722_v11 = vsel %vm1244_vm2, %v5439_v60, 0.0  ;;  %v1701_v28 = vsel %vm1244_vm2, %v5404_v51, 0.0  ;;  %v1728_v48 = vsel %vm1244_vm2, %v5317_v32, 0.0  ;;  %v1707_v8 = vsel %vm1244_vm2, %v5379_v50, 0.0 }
 0x449   : > { %4312 = vpow2.f32 %v1619_v26  ;;  %3976 = vmatprep.subr.bf16.mxu1 %v2390_v0  ;;  %1666 = vadd.xlane.f32.xlu1 %v1665_v18  ;;  %v1695_v26 = vsel %vm1244_vm2, %v5329_v47, 0.0  ;;  %v1734_v47 = vsel %vm1244_vm2, %v5292_v46, 0.0  ;;  %v1713_v60 = vsel %vm1244_vm2, %v5447_v16, 0.0 }
 0x44a   : > { %3977 = vmatpush3.bf16.msra.mxu1 %v2390_v0  ;;  %v2392_v13 = vpop.permute.xlu0 %2391  ;;  %v1740_v51 = vsel %vm1244_vm2, %v5369_v43, 0.0  ;;  %v1719_v32 = vsel %vm1244_vm2, %v5436_v21, 0.0  ;;  %v1746_v50 = vsel %vm1244_vm2, %v5349_v31, 0.0  ;;  %v1725_v46 = vsel %vm1244_vm2, %v5314_v63, 0.0  ;;  %v5978_v0 = vld [vmem:[#allocation28_spill] sm:$0xff] }
 0x44b   : > { %1693 = vadd.xlane.f32.xlu0 %v1692_v20  ;;  %3978 = vmatprep.subr.bf16.mxu1 %v2392_v13  ;;  %v1752_v16 = vsel %vm1244_vm2, %v5494_v17, 0.0  ;;  %v1731_v43 = vsel %vm1244_vm2, %v5290_v56, 0.0  ;;  %v1497_v34 = vsub.f32 %v5978_v0, %v5554_v40  ;;  %v1758_v21 = vsel %vm1244_vm2, %v5484_v57, 0.0 }
 0x44c   : > { %v1737_v31 = vsel %vm1244_vm2, %v5366_v37, 0.0  ;;  %v1743_v57 = vsel %vm1244_vm2, %v5345_v41, 0.0 }
 0x44d   : > { %1672 = vadd.xlane.f32.xlu1 %v1671_v3  ;;  %v1621_v63 = vmul.f32 1.442695, %v1497_v34 }
 0x44e   : > { %3979 = vmatpush3.bf16.msra.mxu1 %v2392_v13  ;;  %v1764_v13 = vsel %vm1244_vm2, %v5508_v4, 0.0 }
 0x44f   : > { %v5568_v12 = vpop.eup %4308  ;;  %1699 = vadd.xlane.f32.xlu0 %v1698_v36  ;;  %4314 = vpow2.f32 %v1621_v63 }
 0x450   : > { %v1849_v45 = vpack.c.bf16 %v5568_v12, %v5564_v42 }
 0x451   : > { %1678 = vadd.xlane.f32.xlu1 %v1677_v6  ;;  %v5574_v58 = vpop.eup %4310  ;;  %v2726_v6 = vld [vmem:[%s5883_s3] sm:$0xf] }
 0x452   : > { %3998 = vmatprep.mubr.msk.bf16.mxu0 %vm1244_vm2, %v1849_v45  ;;  %v2753_v45 = vsel %vm2751_vm3, %v2726_v6, 0 }
 0x453   : > { %v5579_v61 = vpop.eup %4312  ;;  %1705 = vadd.xlane.f32.xlu0 %v1704_v10  ;;  %v5979_v10 = vpack.c.bf16 %v5393_v23, %v5391_v30 }
 0x454   : > { %v1850_v54 = vpack.c.bf16 %v5579_v61, %v5574_v58 }
 0x455   : > { %1684 = vadd.xlane.f32.xlu1 %v1683_v49  ;;  %v5652_v49 = vld [vmem:[%s5883_s3 + $0x4] sm:$0xf] }
 0x457   : > { %1711 = vadd.xlane.f32.xlu0 %v1710_v19  ;;  %v5980_v19 = vpack.c.bf16 %v5473_v24, %v5466_v33 }
 0x459   : > { %1690 = vadd.xlane.f32.xlu1 %v1689_v7 }
 0x45b   : > { %1717 = vadd.xlane.f32.xlu0 %v1716_v44  ;;  %v1761_v44 = vsel %vm1244_vm2, %v5506_v55, 0.0 }
 0x45d   : > { %1696 = vadd.xlane.f32.xlu1 %v1695_v26 }
 0x45f   : > { %1723 = vadd.xlane.f32.xlu0 %v1722_v11  ;;  %v1788_v11 = vsel %vm1244_vm2, %v5473_v24, 0.0  ;;  %v1773_v24 = vsel %vm1244_vm2, %v5420_v15, 0.0  ;;  %v1785_v15 = vsel %vm1244_vm2, %v5466_v33, 0.0  ;;  %v1803_v33 = vsel %vm1244_vm2, %v5574_v58, 0.0 }
 0x461   : > { %1702 = vadd.xlane.f32.xlu1 %v1701_v28 }
 0x463   : > { %1729 = vadd.xlane.f32.xlu0 %v1728_v48 }
 0x465   : > { %1708 = vadd.xlane.f32.xlu1 %v1707_v8  ;;  %v1767_v8 = vsel %vm1244_vm2, %v5498_v39, 0.0  ;;  %v1800_v39 = vsel %vm1244_vm2, %v5568_v12, 0.0 }
 0x467   : > { %1735 = vadd.xlane.f32.xlu0 %v1734_v47 }
 0x469   : > { %1714 = vadd.xlane.f32.xlu1 %v1713_v60  ;;  %v5981_v60 = vpack.c.bf16 %v5515_v38, %v5512_v2 }
 0x46b   : > { %1741 = vadd.xlane.f32.xlu0 %v1740_v51  ;;  %v1794_v51 = vsel %vm1244_vm2, %v5515_v38, 0.0  ;;  %v1779_v38 = vsel %vm1244_vm2, %v5391_v30, 0.0 }
 0x46d   : > { %1720 = vadd.xlane.f32.xlu1 %v1719_v32  ;;  %v1806_v32 = vsel %vm1244_vm2, %v5579_v61, 0.0  ;;  %v1797_v61 = vsel %vm1244_vm2, %v5564_v42, 0.0 }
 0x46f   : > { %1747 = vadd.xlane.f32.xlu0 %v1746_v50 }
 0x471   : > { %1726 = vadd.xlane.f32.xlu1 %v1725_v46 }
 0x473   : > { %1753 = vadd.xlane.f32.xlu0 %v1752_v16 }
 0x475   : > { %1732 = vadd.xlane.f32.xlu1 %v1731_v43 }
 0x477   : > { %1759 = vadd.xlane.f32.xlu0 %v1758_v21 }
 0x479   : > { %1738 = vadd.xlane.f32.xlu1 %v1737_v31  ;;  %v1430_v18 = vpop.xlane.xlu1 %1429 }
 0x47a   : > { %v1498_v17 = vsub.f32 %v5258_v53, %v1430_v18  ;;  %v1770_v53 = vsel %vm1244_vm2, %v5501_v5, 0.0  ;;  %v1755_v5 = vsel %vm1244_vm2, %v5480_v25, 0.0  ;;  %v4315_v25 = vpop.eup %4314 }
 0x47b   : > { %1765 = vadd.xlane.f32.xlu0 %v1764_v13  ;;  %v1433_v56 = vpop.xlane.xlu0 %1432  ;;  %v1809_v50 = vsel %vm1244_vm2, %v4315_v25, 0.0 }
 0x47c   : > { %v1623_v20 = vmul.f32 1.442695, %v1498_v17  ;;  %v1499_v40 = vsub.f32 %v5248_v62, %v1433_v56  ;;  %v1749_v62 = vsel %vm1244_vm2, %v5490_v35, 0.0 }
 0x47d   : > { %1744 = vadd.xlane.f32.xlu1 %v1743_v57  ;;  %v1436_v1 = vpop.xlane.xlu1 %1435 }
 0x47e   : > { %4316 = vpow2.f32 %v1623_v20  ;;  %v1625_v37 = vmul.f32 1.442695, %v1499_v40  ;;  %v1500_v3 = vsub.f32 %v5254_v52, %v1436_v1  ;;  %v1776_v52 = vsel %vm1244_vm2, %v5423_v9, 0.0 }
 0x47f   : > { %1771 = vadd.xlane.f32.xlu0 %v1770_v53  ;;  %v2477_v4 = vpop.permute.xlu0 %2476  ;;  %v1782_v9 = vsel %vm1244_vm2, %v5393_v23, 0.0 }
 0x480   : > { %v1627_v36 = vmul.f32 1.442695, %v1500_v3  ;;  %3990 = vmatprep.subr.bf16.mxu0 %v2477_v4  ;;  %4318 = vpow2.f32 %v1625_v37 }
 0x481   : > { %3991 = vmatpush3.bf16.msra.mxu0 %v2477_v4  ;;  %1750 = vadd.xlane.f32.xlu1 %v1749_v62  ;;  %v2394_v41 = vpop.permute.xlu1 %2393 }
 0x482   : > { %4320 = vpow2.f32 %v1627_v36  ;;  %3980 = vmatprep.subr.bf16.mxu1 %v2394_v41 }
 0x483   : > { %1777 = vadd.xlane.f32.xlu0 %v1776_v52  ;;  %3981 = vmatpush3.bf16.msra.mxu1 %v2394_v41 }
 0x484   : > { %4174 = vmatprep.subr.msk.bf16.mxu1 %vm2751_vm3, %v2726_v6 }
 0x485   : > { %1756 = vadd.xlane.f32.xlu1 %v1755_v5  ;;  %v2479_v35 = vpop.permute.xlu1 %2478 }
 0x486   : > { %3983 = vmatmul.mubr.msk.bf16.vlgmr.msra.gmra.mrb[40].mxu1 %vm1244_vm2, %v5979_v10  ;;  %3992 = vmatprep.subr.bf16.mxu0 %v2479_v35 }
 0x487   : > { %1783 = vadd.xlane.f32.xlu0 %v1782_v9  ;;  %3986 = vmatprep.mubr.msk.bf16.mxu1 %vm1244_vm2, %v5980_v19 }
 0x488   : > { %v4317_v7 = vpop.eup %4316  ;;  %3993 = vmatpush3.bf16.msra.mxu0 %v2479_v35  ;;  %4007 = vmatpush3.bf16.msra.mxu1 %v2753_v45 }
 0x489   : > { %1762 = vadd.xlane.f32.xlu1 %v1761_v44  ;;  %v2481_v23 = vpop.permute.xlu1 %2480  ;;  %v1851_v26 = vpack.c.bf16 %v4317_v7, %v4315_v25  ;;  %4175 = vmatprep.subr.msk.bf16.mxu1 %vm2751_vm3, %v5652_v49  ;;  %v1812_v12 = vsel %vm1244_vm2, %v4317_v7, 0.0 }
 0x48a   : > { %3994 = vmatprep.subr.bf16.mxu0 %v2481_v23  ;;  %v4319_v28 = vpop.eup %4318 }
 0x48b   : > { %1789 = vadd.xlane.f32.xlu0 %v1788_v11  ;;  %v1815_v46 = vsel %vm1244_vm2, %v4319_v28, 0.0 }
 0x48c   : > { %v4321_v48 = vpop.eup %4320  ;;  %3995 = vmatpush3.bf16.msra.mxu0 %v2481_v23 }
 0x48d   : > { %1768 = vadd.xlane.f32.xlu1 %v1767_v8  ;;  %v2483_v55 = vpop.permute.xlu1 %2482  ;;  %v1852_v47 = vpack.c.bf16 %v4321_v48, %v4319_v28  ;;  %v1818_v30 = vsel %vm1244_vm2, %v4321_v48, 0.0 }
 0x48e   : > { %3987 = vmatmul.mubr.msk.bf16.gmra.mrb[44].mxu1 %vm1244_vm2, %v5981_v60  ;;  %3996 = vmatprep.subr.bf16.mxu0 %v2483_v55 }
 0x48f   : > { %1795 = vadd.xlane.f32.xlu0 %v1794_v51  ;;  %v5982_v51 = vld [vmem:[#allocation31_spill] sm:$0xff] }
 0x490   : > { %3997 = vmatpush3.bf16.msra.mxu0 %v2483_v55 }
 0x491   : > { %1774 = vadd.xlane.f32.xlu1 %v1773_v24 }
 0x493   : > { %3999 = vmatmul.mubr.msk.bf16.vlgmr.msra.gmra.mrb[88].mxu0 %vm1244_vm2, %v1850_v54  ;;  %1801 = vadd.xlane.f32.xlu0 %v1800_v39  ;;  %v1791_v54 = vsel %vm1244_vm2, %v5512_v2, 0.0 }
 0x494   : > { %4002 = vmatprep.mubr.msk.bf16.mxu0 %vm1244_vm2, %v1851_v26 }
 0x495   : > { %1780 = vadd.xlane.f32.xlu1 %v1779_v38 }
 0x497   : > { %1807 = vadd.xlane.f32.xlu0 %v1806_v32 }
 0x499   : > { %1786 = vadd.xlane.f32.xlu1 %v1785_v15 }
 0x49b   : > { %4003 = vmatmul.mubr.msk.bf16.gmra.mrb[92].mxu0 %vm1244_vm2, %v1852_v47  ;;  %1813 = vadd.xlane.f32.xlu0 %v1812_v12  ;;  %v5748_v47 = vld [vmem:[%s5883_s3 + $0x8] sm:$0xf]  ;;  %v5983_v12 = vld [vmem:[#allocation29_spill] sm:$0xff] }
 0x49d   : > { %1792 = vadd.xlane.f32.xlu1 %v1791_v54 }
 0x49f   : > { %1819 = vadd.xlane.f32.xlu0 %v1818_v30  ;;  %v5984_v30 = vld [vmem:[#allocation30_spill] sm:$0xff] }
 0x4a1   : > { %1798 = vadd.xlane.f32.xlu1 %v1797_v61 }
 0x4a5   : > { %1804 = vadd.xlane.f32.xlu1 %v1803_v33 }
 0x4a9   : > { %1810 = vadd.xlane.f32.xlu1 %v1809_v50 }
 0x4ad   : > { %v5698_v16 = vpop.f32.mrb[24].mxu1  ;;  %1816 = vadd.xlane.f32.xlu1 %v1815_v46 }
 0x4ae   : > { %v5700_v2 = vpop.f32.mrb[25].mxu1 }
 0x4af   : > { %v5702_v43 = vpop.f32.mrb[26].mxu1 }
 0x4b0   : > { %v5704_v0 = vpop.f32.mrb[27].mxu1  ;;  %v1634_v42 = vpop.xlane.xlu0 %1633 }
 0x4b1   : > { %4322 = vrcp.f32 %v1634_v42 }
 0x4b4   : > { %v1640_v34 = vpop.xlane.xlu0 %1639 }
 0x4b8   : > { %v1646_v21 = vpop.xlane.xlu0 %1645 }
 0x4bb   : > { %v4323_v3 = vpop.eup %4322 }
 0x4bc   : > { %v1652_v31 = vpop.xlane.xlu0 %1651  ;;  %v2630_v52 = vmul.f32 %v4323_v3, %v5309_v27 }
 0x4bd   : > { %v5706_v58 = vpop.f32.mrb[28].mxu1 }
 0x4be   : > { %v5708_v63 = vpop.f32.mrb[29].mxu1  ;;  %v1631_v18 = vpop.xlane.xlu1 %1630 }
 0x4bf   : > { %4324 = vrcp.f32 %v1631_v18  ;;  %v5710_v17 = vpop.f32.mrb[30].mxu1 }
 0x4c0   : > { %v5712_v13 = vpop.f32.mrb[31].mxu1  ;;  %v1658_v56 = vpop.xlane.xlu0 %1657  ;;  %4326 = vrcp.f32 %v1640_v34 }
 0x4c2   : > { %v1637_v20 = vpop.xlane.xlu1 %1636 }
 0x4c3   : > { %4328 = vrcp.f32 %v1637_v20 }
 0x4c4   : > { %v1664_v40 = vpop.xlane.xlu0 %1663  ;;  %4330 = vrcp.f32 %v1646_v21 }
 0x4c5   : > { %v5714_v57 = vpop.f32.mrb[32].mxu1 }
 0x4c6   : > { %v5716_v1 = vpop.f32.mrb[33].mxu1  ;;  %v1643_v37 = vpop.xlane.xlu1 %1642 }
 0x4c7   : > { %4332 = vrcp.f32 %v1643_v37  ;;  %v5718_v53 = vpop.f32.mrb[34].mxu1 }
 0x4c8   : > { %v5720_v4 = vpop.f32.mrb[35].mxu1  ;;  %v1670_v36 = vpop.xlane.xlu0 %1669  ;;  %4334 = vrcp.f32 %v1652_v31 }
 0x4c9   : > { %v4325_v62 = vpop.eup %4324 }
 0x4ca   : > { %v1649_v41 = vpop.xlane.xlu1 %1648  ;;  %v2629_v6 = vmul.f32 %v4325_v62, %v5302_v14  ;;  %v4327_v5 = vpop.eup %4326 }
 0x4cb   : > { %4336 = vrcp.f32 %v1649_v41  ;;  %v2632_v19 = vmul.f32 %v4327_v5, %v5307_v59  ;;  %v2901_v59 = vsel %vm2751_vm3, %v5652_v49, 0  ;;  %v5987_v5 = vld [vmem:[#allocation32_spill] sm:$0xff] }
 0x4cc   : > { %v1676_v35 = vpop.xlane.xlu0 %1675  ;;  %v2693_v45 = vpack.c.bf16 %v2630_v52, %v2629_v6  ;;  %4338 = vrcp.f32 %v1658_v56  ;;  %v5985_v56 = vld [vmem:[#allocation33_spill] sm:$0xff] }
 0x4cd   : > { %v4329_v10 = vpop.eup %4328  ;;  %v5724_v9 = vpop.f32.mrb[72].mxu0 }
 0x4ce   : > { %v5726_v25 = vpop.f32.mrb[36].mxu1  ;;  %v2631_v7 = vmul.f32 %v4329_v10, %v5298_v22  ;;  %v5730_v44 = vpop.f32.mrb[73].mxu0  ;;  %4008 = vmatprep.mubr.msk.bf16.mxu1 %vm475_vm1, %v2693_v45  ;;  %v5988_v45 = vld [vmem:[#allocation34_spill] sm:$0xff] }
 0x4cf   : > { %v5732_v23 = vpop.f32.mrb[37].mxu1  ;;  %v4331_v14 = vpop.eup %4330 }
 0x4d0   : > { %v1655_v27 = vpop.xlane.xlu1 %1654  ;;  %v5735_v26 = vpop.f32.mrb[74].mxu0  ;;  %v2694_v11 = vpack.c.bf16 %v2632_v19, %v2631_v7  ;;  %v2634_v24 = vmul.f32 %v4331_v14, %v5982_v51 }
 0x4d1   : > { %4340 = vrcp.f32 %v1655_v27  ;;  %v5737_v28 = vpop.f32.mrb[38].mxu1  ;;  %v1682_v48 = vpop.xlane.xlu0 %1681 }
 0x4d2   : > { %v4333_v8 = vpop.eup %4332  ;;  %v5741_v22 = vpop.f32.mrb[39].mxu1  ;;  %4342 = vrcp.f32 %v1664_v40  ;;  %4009 = vmatmul.mubr.msk.bf16.vlgmr.msra.gmra.mrb[48].mxu1 %vm475_vm1, %v2694_v11  ;;  %v5986_v40 = vld [vmem:[#allocation35_spill] sm:$0xff] }
 0x4d3   : > { %v5743_v55 = vpop.f32.mrb[75].mxu0  ;;  %v2633_v60 = vmul.f32 %v4333_v8, %v5336_v29  ;;  %v4335_v39 = vpop.eup %4334  ;;  %4025 = vmatpush3.bf16.msra.mxu1 %v2901_v59  ;;  %v5989_v59 = vld [vmem:[#allocation37_spill] sm:$0xff] }
 0x4d4   : > { %v1661_v38 = vpop.xlane.xlu1 %1660  ;;  %4176 = vmatprep.subr.msk.bf16.mxu1 %vm2751_vm3, %v5748_v47  ;;  %v2636_v61 = vmul.f32 %v4335_v39, %v5984_v30 }
 0x4d5   : > { %4344 = vrcp.f32 %v1661_v38  ;;  %v1688_v49 = vpop.xlane.xlu0 %1687  ;;  %v2695_v32 = vpack.c.bf16 %v2634_v24, %v2633_v60  ;;  %v4337_v15 = vpop.eup %4336  ;;  %v5990_v60 = vld [vmem:[#allocation3_spill] sm:$0xff] }
 0x4d6   : > { %4346 = vrcp.f32 %v1670_v36  ;;  %v2635_v54 = vmul.f32 %v4337_v15, %v5983_v12  ;;  %v4339_v33 = vpop.eup %4338  ;;  %v5991_v12 = vld [vmem:[#allocation36_spill] sm:$0xff] }
 0x4d7   : > { %4012 = vmatprep.mubr.msk.bf16.mxu1 %vm475_vm1, %v2695_v32  ;;  %v2638_v37 = vmul.f32 %v4339_v33, %v5986_v40 }
 0x4d8   : > { %v1667_v29 = vpop.xlane.xlu1 %1666  ;;  %v2696_v46 = vpack.c.bf16 %v2636_v61, %v2635_v54  ;;  %v5992_v54 = vld [vmem:[#allocation38_spill] sm:$0xff] }
 0x4d9   : > { %4348 = vrcp.f32 %v1667_v29  ;;  %v1694_v50 = vpop.xlane.xlu0 %1693  ;;  %v5758_v42 = vpop.f32.mrb[76].mxu0 }
 0x4da   : > { %4350 = vrcp.f32 %v1676_v35  ;;  %v5760_v21 = vpop.f32.mrb[77].mxu0  ;;  %4013 = vmatmul.mubr.msk.bf16.gmra.mrb[52].mxu1 %vm475_vm1, %v2696_v46 }
 0x4db   : > { %v4341_v34 = vpop.eup %4340  ;;  %v5763_v18 = vpop.f32.mrb[78].mxu0 }
 0x4dc   : > { %v1673_v31 = vpop.xlane.xlu1 %1672  ;;  %v2637_v20 = vmul.f32 %v4341_v34, %v5985_v56  ;;  %v4343_v3 = vpop.eup %4342 }
 0x4dd   : > { %4352 = vrcp.f32 %v1673_v31  ;;  %v1700_v36 = vpop.xlane.xlu0 %1699  ;;  %v5767_v62 = vpop.f32.mrb[79].mxu0  ;;  %v2640_v10 = vmul.f32 %v4343_v3, %v5988_v45 }
 0x4de   : > { %v2697_v41 = vpack.c.bf16 %v2638_v37, %v2637_v20  ;;  %4354 = vrcp.f32 %v1682_v48 }
 0x4df   : > { %v4345_v6 = vpop.eup %4344 }
 0x4e0   : > { %4016 = vmatprep.mubr.msk.bf16.mxu1 %vm475_vm1, %v2697_v41  ;;  %v1679_v52 = vpop.xlane.xlu1 %1678  ;;  %v2639_v35 = vmul.f32 %v4345_v6, %v5987_v5  ;;  %v4347_v19 = vpop.eup %4346 }
 0x4e1   : > { %4356 = vrcp.f32 %v1679_v52  ;;  %v1706_v7 = vpop.xlane.xlu0 %1705  ;;  %v2642_v48 = vmul.f32 %v4347_v19, %v5990_v60 }
 0x4e2   : > { %v2698_v14 = vpack.c.bf16 %v2640_v10, %v2639_v35  ;;  %4358 = vrcp.f32 %v1688_v49 }
 0x4e3   : > { %v4349_v27 = vpop.eup %4348 }
 0x4e4   : > { %4017 = vmatmul.mubr.msk.bf16.gmra.mrb[56].mxu1 %vm475_vm1, %v2698_v14  ;;  %v1685_v11 = vpop.xlane.xlu1 %1684  ;;  %v2641_v8 = vmul.f32 %v4349_v27, %v5989_v59  ;;  %v4351_v51 = vpop.eup %4350 }
 0x4e5   : > { %4360 = vrcp.f32 %v1685_v11  ;;  %v1712_v24 = vpop.xlane.xlu0 %1711  ;;  %v2644_v30 = vmul.f32 %v4351_v51, %v5992_v54 }
 0x4e6   : > { %v2699_v39 = vpack.c.bf16 %v2642_v48, %v2641_v8  ;;  %4362 = vrcp.f32 %v1694_v50 }
 0x4e7   : > { %v4353_v38 = vpop.eup %4352  ;;  %v5776_v15 = vpop.f32.mrb[80].mxu0 }
 0x4e8   : > { %4020 = vmatprep.mubr.msk.bf16.mxu1 %vm475_vm1, %v2699_v39  ;;  %v1691_v32 = vpop.xlane.xlu1 %1690  ;;  %v2643_v49 = vmul.f32 %v4353_v38, %v5991_v12  ;;  %v4355_v61 = vpop.eup %4354 }
 0x4e9   : > { %4364 = vrcp.f32 %v1691_v32  ;;  %v1718_v29 = vpop.xlane.xlu0 %1717  ;;  %v5780_v33 = vpop.f32.mrb[81].mxu0  ;;  %v2646_v40 = vmul.f32 %v4355_v61, %v5704_v0 }
 0x4ea   : > { %v5782_v46 = vpop.f32.mrb[82].mxu0  ;;  %v2700_v34 = vpack.c.bf16 %v2644_v30, %v2643_v49  ;;  %4366 = vrcp.f32 %v1700_v36 }
 0x4eb   : > { %v4357_v31 = vpop.eup %4356  ;;  %v5784_v50 = vpop.f32.mrb[83].mxu0 }
 0x4ec   : > { %4021 = vmatmul.mubr.msk.bf16.gmra.mrb[60].mxu1 %vm475_vm1, %v2700_v34  ;;  %v1697_v56 = vpop.xlane.xlu1 %1696  ;;  %v2645_v20 = vmul.f32 %v4357_v31, %v5700_v2  ;;  %v4359_v37 = vpop.eup %4358 }
 0x4ed   : > { %4368 = vrcp.f32 %v1697_v56  ;;  %v1724_v3 = vpop.xlane.xlu0 %1723  ;;  %v2648_v52 = vmul.f32 %v4359_v37, %v5702_v43 }
 0x4ee   : > { %v2701_v41 = vpack.c.bf16 %v2646_v40, %v2645_v20  ;;  %4370 = vrcp.f32 %v1706_v7  ;;  %v3043_v7 = vsel %vm2751_vm3, %v5748_v47, 0 }
 0x4ef   : > { %v4361_v6 = vpop.eup %4360  ;;  %v5792_v35 = vpop.f32.mrb[84].mxu0 }
 0x4f0   : > { %v2647_v5 = vmul.f32 %v4361_v6, %v5698_v16  ;;  %4026 = vmatprep.mubr.msk.bf16.mxu1 %vm475_vm1, %v2701_v41  ;;  %v1703_v36 = vpop.xlane.xlu1 %1702  ;;  %v4363_v45 = vpop.eup %4362  ;;  %v5805_v16 = vld [vmem:[%s5883_s3 + $0xc] sm:$0xf] }
 0x4f1   : > { %4372 = vrcp.f32 %v1703_v36  ;;  %v1730_v2 = vpop.xlane.xlu0 %1729  ;;  %v5794_v10 = vpop.f32.mrb[85].mxu0  ;;  %v2650_v59 = vmul.f32 %v4363_v45, %v5712_v13 }
 0x4f2   : > { %v2702_v0 = vpack.c.bf16 %v2648_v52, %v2647_v5  ;;  %v5796_v19 = vpop.f32.mrb[86].mxu0  ;;  %4374 = vrcp.f32 %v1712_v24 }
 0x4f3   : > { %v4365_v14 = vpop.eup %4364  ;;  %v5800_v43 = vpop.f32.mrb[87].mxu0 }
 0x4f4   : > { %4027 = vmatmul.mubr.msk.bf16.vlgmr.msra.gmra.mrb[48].mxu1 %vm475_vm1, %v2702_v0  ;;  %v1709_v27 = vpop.xlane.xlu1 %1708  ;;  %v2649_v11 = vmul.f32 %v4365_v14, %v5708_v63  ;;  %v4367_v8 = vpop.eup %4366 }
 0x4f5   : > { %4376 = vrcp.f32 %v1709_v27  ;;  %v1736_v60 = vpop.xlane.xlu0 %1735  ;;  %4043 = vmatpush3.bf16.msra.mxu1 %v3043_v7  ;;  %v2652_v39 = vmul.f32 %v4367_v8, %v5710_v17 }
 0x4f6   : > { %v2703_v47 = vpack.c.bf16 %v2650_v59, %v2649_v11  ;;  %4177 = vmatprep.subr.msk.bf16.mxu1 %vm2751_vm3, %v5805_v16  ;;  %4378 = vrcp.f32 %v1718_v29 }
 0x4f7   : > { %v4369_v48 = vpop.eup %4368 }
 0x4f8   : > { %4030 = vmatprep.mubr.msk.bf16.mxu1 %vm475_vm1, %v2703_v47  ;;  %v1715_v51 = vpop.xlane.xlu1 %1714  ;;  %v2651_v24 = vmul.f32 %v4369_v48, %v5706_v58  ;;  %v4371_v63 = vpop.eup %4370 }
 0x4f9   : > { %4380 = vrcp.f32 %v1715_v51  ;;  %v1742_v13 = vpop.xlane.xlu0 %1741  ;;  %v2654_v54 = vmul.f32 %v4371_v63, %v5743_v55 }
 0x4fa   : > { %v2704_v38 = vpack.c.bf16 %v2652_v39, %v2651_v24  ;;  %4382 = vrcp.f32 %v1724_v3 }
 0x4fb   : > { %v4373_v32 = vpop.eup %4372 }
 0x4fc   : > { %4031 = vmatmul.mubr.msk.bf16.gmra.mrb[52].mxu1 %vm475_vm1, %v2704_v38  ;;  %v1721_v12 = vpop.xlane.xlu1 %1720  ;;  %v2653_v49 = vmul.f32 %v4373_v32, %v5730_v44  ;;  %v4375_v30 = vpop.eup %4374 }
 0x4fd   : > { %4384 = vrcp.f32 %v1721_v12  ;;  %v1748_v58 = vpop.xlane.xlu0 %1747  ;;  %v2656_v31 = vmul.f32 %v4375_v30, %v5735_v26 }
 0x4fe   : > { %v2705_v61 = vpack.c.bf16 %v2654_v54, %v2653_v49  ;;  %4386 = vrcp.f32 %v1730_v2 }
 0x4ff   : > { %v4377_v29 = vpop.eup %4376 }
 0x500   : > { %4034 = vmatprep.mubr.msk.bf16.mxu1 %vm475_vm1, %v2705_v61  ;;  %v1727_v17 = vpop.xlane.xlu1 %1726  ;;  %v2655_v34 = vmul.f32 %v4377_v29, %v5724_v9  ;;  %v4379_v56 = vpop.eup %4378 }
 0x501   : > { %4388 = vrcp.f32 %v1727_v17  ;;  %v2658_v37 = vmul.f32 %v4379_v56, %v5767_v62  ;;  %v1754_v41 = vpop.xlane.xlu0 %1753 }
 0x502   : > { %v2706_v20 = vpack.c.bf16 %v2656_v31, %v2655_v34  ;;  %4390 = vrcp.f32 %v1736_v60 }
 0x503   : > { %v4381_v40 = vpop.eup %4380 }
 0x504   : > { %4035 = vmatmul.mubr.msk.bf16.gmra.mrb[56].mxu1 %vm475_vm1, %v2706_v20  ;;  %v1733_v44 = vpop.xlane.xlu1 %1732  ;;  %v2657_v55 = vmul.f32 %v4381_v40, %v5760_v21  ;;  %v4383_v3 = vpop.eup %4382 }
 0x505   : > { %4392 = vrcp.f32 %v1733_v44  ;;  %v2660_v5 = vmul.f32 %v4383_v3, %v5763_v18  ;;  %v1760_v21 = vpop.xlane.xlu0 %1759 }
 0x506   : > { %v2707_v6 = vpack.c.bf16 %v2658_v37, %v2657_v55  ;;  %4394 = vrcp.f32 %v1742_v13 }
 0x507   : > { %v4385_v52 = vpop.eup %4384 }
 0x508   : > { %4038 = vmatprep.mubr.msk.bf16.mxu1 %vm475_vm1, %v2707_v6  ;;  %v1739_v9 = vpop.xlane.xlu1 %1738  ;;  %v2659_v26 = vmul.f32 %v4385_v52, %v5758_v42  ;;  %v4387_v36 = vpop.eup %4386 }
 0x509   : > { %4396 = vrcp.f32 %v1739_v9  ;;  %v2662_v7 = vmul.f32 %v4387_v36, %v5720_v4  ;;  %v1766_v47 = vpop.xlane.xlu0 %1765 }
 0x50a   : > { %v2708_v45 = vpack.c.bf16 %v2660_v5, %v2659_v26  ;;  %4398 = vrcp.f32 %v1748_v58 }
 0x50b   : > { %v4389_v2 = vpop.eup %4388 }
 0x50c   : > { %4039 = vmatmul.mubr.msk.bf16.gmra.mrb[60].mxu1 %vm475_vm1, %v2708_v45  ;;  %v1745_v62 = vpop.xlane.xlu1 %1744  ;;  %v2661_v0 = vmul.f32 %v4389_v2, %v5716_v1  ;;  %v4391_v14 = vpop.eup %4390  ;;  %v3185_v1 = vsel %vm2751_vm3, %v5805_v16, 0 }
 0x50d   : > { %4400 = vrcp.f32 %v1745_v62  ;;  %v2664_v42 = vmul.f32 %v4391_v14, %v5718_v53  ;;  %v1772_v63 = vpop.xlane.xlu0 %1771 }
 0x50e   : > { %v2709_v27 = vpack.c.bf16 %v2662_v7, %v2661_v0  ;;  %4402 = vrcp.f32 %v1754_v41 }
 0x50f   : > { %v4393_v11 = vpop.eup %4392 }
 0x510   : > { %v2663_v18 = vmul.f32 %v4393_v11, %v5714_v57  ;;  %4044 = vmatprep.mubr.msk.bf16.mxu1 %vm475_vm1, %v2709_v27  ;;  %v1751_v59 = vpop.xlane.xlu1 %1750  ;;  %v4395_v8 = vpop.eup %4394 }
 0x511   : > { %4404 = vrcp.f32 %v1751_v59  ;;  %v2666_v53 = vmul.f32 %v4395_v8, %v5741_v22 }
 0x512   : > { %v2710_v60 = vpack.c.bf16 %v2664_v42, %v2663_v18  ;;  %4406 = vrcp.f32 %v1760_v21 }
 0x513   : > { %v4397_v4 = vpop.eup %4396 }
 0x514   : > { %4045 = vmatmul.mubr.msk.bf16.vlgmr.msra.gmra.mrb[48].mxu1 %vm475_vm1, %v2710_v60  ;;  %v1757_v48 = vpop.xlane.xlu1 %1756  ;;  %v2665_v51 = vmul.f32 %v4397_v4, %v5732_v23  ;;  %v4399_v57 = vpop.eup %4398 }
 0x515   : > { %4408 = vrcp.f32 %v1757_v48  ;;  %4061 = vmatpush3.bf16.msra.mxu1 %v3185_v1  ;;  %v2668_v38 = vmul.f32 %v4399_v57, %v5737_v28 }
 0x516   : > { %v2711_v24 = vpack.c.bf16 %v2666_v53, %v2665_v51  ;;  %4410 = vrcp.f32 %v1766_v47 }
 0x517   : > { %v4401_v39 = vpop.eup %4400 }
 0x518   : > { %4048 = vmatprep.mubr.msk.bf16.mxu1 %vm475_vm1, %v2711_v24  ;;  %v1763_v13 = vpop.xlane.xlu1 %1762  ;;  %v2667_v16 = vmul.f32 %v4401_v39, %v5726_v25  ;;  %v4403_v32 = vpop.eup %4402 }
 0x519   : > { %4412 = vrcp.f32 %v1763_v13  ;;  %v2670_v54 = vmul.f32 %v4403_v32, %v5784_v50 }
 0x51a   : > { %v2712_v12 = vpack.c.bf16 %v2668_v38, %v2667_v16  ;;  %4414 = vrcp.f32 %v1772_v63 }
 0x51b   : > { %v4405_v23 = vpop.eup %4404 }
 0x51c   : > { %4049 = vmatmul.mubr.msk.bf16.gmra.mrb[52].mxu1 %vm475_vm1, %v2712_v12  ;;  %v1769_v22 = vpop.xlane.xlu1 %1768  ;;  %v2669_v49 = vmul.f32 %v4405_v23, %v5780_v33  ;;  %v4407_v30 = vpop.eup %4406 }
 0x51d   : > { %4416 = vrcp.f32 %v1769_v22  ;;  %v2672_v28 = vmul.f32 %v4407_v30, %v5782_v46  ;;  %v1778_v46 = vpop.xlane.xlu0 %1777 }
 0x51e   : > { %v2713_v61 = vpack.c.bf16 %v2670_v54, %v2669_v49  ;;  %4418 = vrcp.f32 %v1778_v46 }
 0x51f   : > { %v4409_v29 = vpop.eup %4408 }
 0x520   : > { %4052 = vmatprep.mubr.msk.bf16.mxu1 %vm475_vm1, %v2713_v61  ;;  %v2671_v25 = vmul.f32 %v4409_v29, %v5776_v15  ;;  %v4411_v58 = vpop.eup %4410  ;;  %v1775_v55 = vpop.xlane.xlu1 %1774 }
 0x521   : > { %v2674_v33 = vmul.f32 %v4411_v58, %v5800_v43  ;;  %v1784_v37 = vpop.xlane.xlu0 %1783 }
 0x522   : > { %v2714_v17 = vpack.c.bf16 %v2672_v28, %v2671_v25  ;;  %4420 = vrcp.f32 %v1784_v37 }
 0x523   : > { %v4413_v34 = vpop.eup %4412 }
 0x524   : > { %4053 = vmatmul.mubr.msk.bf16.gmra.mrb[56].mxu1 %vm475_vm1, %v2714_v17  ;;  %v2673_v31 = vmul.f32 %v4413_v34, %v5794_v10  ;;  %v4415_v50 = vpop.eup %4414  ;;  %v1781_v3 = vpop.xlane.xlu1 %1780 }
 0x525   : > { %v2676_v15 = vmul.f32 %v4415_v50, %v5796_v19  ;;  %v1790_v41 = vpop.xlane.xlu0 %1789  ;;  %4422 = vrcp.f32 %v1781_v3 }
 0x526   : > { %v2715_v56 = vpack.c.bf16 %v2674_v33, %v2673_v31  ;;  %4424 = vrcp.f32 %v1775_v55 }
 0x527   : > { %v4417_v20 = vpop.eup %4416  ;;  %4426 = vrcp.f32 %v1790_v41 }
 0x528   : > { %4056 = vmatprep.mubr.msk.bf16.mxu1 %vm475_vm1, %v2715_v56  ;;  %v2675_v40 = vmul.f32 %v4417_v20, %v5792_v35  ;;  %v1787_v10 = vpop.xlane.xlu1 %1786  ;;  %v4419_v26 = vpop.eup %4418 }
 0x529   : > { %v1796_v6 = vpop.xlane.xlu0 %1795 }
 0x52a   : > { %v2716_v44 = vpack.c.bf16 %v2676_v15, %v2675_v40  ;;  %4428 = vrcp.f32 %v1796_v6 }
 0x52c   : > { %4057 = vmatmul.mubr.msk.bf16.gmra.mrb[60].mxu1 %vm475_vm1, %v2716_v44  ;;  %v1793_v43 = vpop.xlane.xlu1 %1792  ;;  %v4421_v36 = vpop.eup %4420 }
 0x52d   : > { %v1802_v52 = vpop.xlane.xlu0 %1801  ;;  %4430 = vrcp.f32 %v1793_v43 }
 0x52e   : > { %4432 = vrcp.f32 %v1787_v10 }
 0x52f   : > { %v4423_v2 = vpop.eup %4422  ;;  %4434 = vrcp.f32 %v1802_v52  ;;  %v3524_v52 = vld [vmem:[%s5884_s4] ss:$0 sm:$0xff] }
 0x530   : > { %v1799_v9 = vpop.xlane.xlu1 %1798  ;;  %v4425_v62 = vpop.eup %4424 }
 0x531   : > { %v1808_v35 = vpop.xlane.xlu0 %1807  ;;  %v4427_v60 = vpop.eup %4426 }
 0x532   : > { %4436 = vrcp.f32 %v1808_v35 }
 0x534   : > { %v1805_v19 = vpop.xlane.xlu1 %1804  ;;  %v4429_v1 = vpop.eup %4428 }
 0x535   : > { %v1814_v0 = vpop.xlane.xlu0 %1813  ;;  %4438 = vrcp.f32 %v1805_v19 }
 0x536   : > { %4440 = vrcp.f32 %v1799_v9 }
 0x537   : > { %v4431_v51 = vpop.eup %4430  ;;  %4442 = vrcp.f32 %v1814_v0 }
 0x538   : > { %v1811_v11 = vpop.xlane.xlu1 %1810  ;;  %v4433_v24 = vpop.eup %4432 }
 0x539   : > { %v1820_v4 = vpop.xlane.xlu0 %1819  ;;  %v4435_v32 = vpop.eup %4434 }
 0x53a   : > { %4444 = vrcp.f32 %v1820_v4 }
 0x53c   : > { %v1817_v53 = vpop.xlane.xlu1 %1816  ;;  %v4437_v22 = vpop.eup %4436 }
 0x53d   : > { %4446 = vrcp.f32 %v1817_v53 }
 0x53e   : > { %4448 = vrcp.f32 %v1811_v11 }
 0x53f   : > { %v4439_v30 = vpop.eup %4438 }
 0x540   : > { %v4441_v29 = vpop.eup %4440 }
 0x541   : > { %v4443_v50 = vpop.eup %4442 }
 0x544   : > { %v4445_v20 = vpop.eup %4444 }
 0x547   : > { %v4447_v15 = vpop.eup %4446 }
 0x548   : > { %v4449_v46 = vpop.eup %4448 }
 0x559   : > { %v3984_v5 = vpop.f32.mrb[40].mxu1 }
 0x55a   : > { %v2445_v45 = vpop.f32.mrb[41].mxu1  ;;  %v2679_v7 = vmul.f32 %v4423_v2, %v3984_v5 }
 0x55b   : > { %v3985_v21 = vpop.f32.mrb[42].mxu1  ;;  %v2677_v42 = vmul.f32 %v4425_v62, %v2445_v45 }
 0x55c   : > { %v2680_v14 = vmul.f32 %v4421_v36, %v3985_v21  ;;  %v2448_v27 = vpop.f32.mrb[43].mxu1 }
 0x55d   : > { %v2678_v18 = vmul.f32 %v4419_v26, %v2448_v27 }
 0x55e   : > { %v2718_v59 = vpack.c.bf16 %v2680_v14, %v2679_v7 }
 0x55f   : > { %v2717_v8 = vpack.c.bf16 %v2678_v18, %v2677_v42 }
 0x561   : > { %v3988_v47 = vpop.f32.mrb[44].mxu1  ;;  %4062 = vmatprep.mubr.msk.bf16.mxu1 %vm475_vm1, %v2717_v8 }
 0x562   : > { %v2461_v48 = vpop.f32.mrb[45].mxu1  ;;  %4063 = vmatmul.mubr.msk.bf16.vlgmr.msra.gmra.mrb[48].mxu1 %vm475_vm1, %v2718_v59  ;;  %v2683_v39 = vmul.f32 %v4431_v51, %v3988_v47 }
 0x563   : > { %v3989_v57 = vpop.f32.mrb[46].mxu1  ;;  %v2681_v16 = vmul.f32 %v4433_v24, %v2461_v48 }
 0x564   : > { %v2684_v63 = vmul.f32 %v4429_v1, %v3989_v57  ;;  %v2464_v13 = vpop.f32.mrb[47].mxu1 }
 0x565   : > { %v2682_v38 = vmul.f32 %v4427_v60, %v2464_v13 }
 0x566   : > { %v2720_v12 = vpack.c.bf16 %v2684_v63, %v2683_v39  ;;  %v4000_v23 = vpop.f32.mrb[88].mxu0 }
 0x567   : > { %v2719_v49 = vpack.c.bf16 %v2682_v38, %v2681_v16  ;;  %v2534_v54 = vpop.f32.mrb[89].mxu0  ;;  %v2687_v25 = vmul.f32 %v4439_v30, %v4000_v23 }
 0x568   : > { %v4001_v61 = vpop.f32.mrb[90].mxu0  ;;  %v2685_v17 = vmul.f32 %v4441_v29, %v2534_v54 }
 0x569   : > { %v2688_v28 = vmul.f32 %v4437_v22, %v4001_v61  ;;  %v2537_v58 = vpop.f32.mrb[91].mxu0  ;;  %4066 = vmatprep.mubr.msk.bf16.mxu1 %vm475_vm1, %v2719_v49 }
 0x56a   : > { %v2686_v34 = vmul.f32 %v4435_v32, %v2537_v58  ;;  %4067 = vmatmul.mubr.msk.bf16.gmra.mrb[52].mxu1 %vm475_vm1, %v2720_v12 }
 0x56b   : > { %v2722_v31 = vpack.c.bf16 %v2688_v28, %v2687_v25 }
 0x56c   : > { %v2721_v33 = vpack.c.bf16 %v2686_v34, %v2685_v17 }
 0x56e   : > { %v4004_v56 = vpop.f32.mrb[92].mxu0  ;;  %4070 = vmatprep.mubr.msk.bf16.mxu1 %vm475_vm1, %v2721_v33 }
 0x56f   : > { %v2550_v40 = vpop.f32.mrb[93].mxu0  ;;  %v2691_v55 = vmul.f32 %v4447_v15, %v4004_v56 }
 0x570   : > { %v4005_v44 = vpop.f32.mrb[94].mxu0  ;;  %v2689_v41 = vmul.f32 %v4449_v46, %v2550_v40 }
 0x571   : > { %v2692_v37 = vmul.f32 %v4445_v20, %v4005_v44  ;;  %v2553_v3 = vpop.f32.mrb[95].mxu0 }
 0x572   : > { %v2690_v10 = vmul.f32 %v4443_v50, %v2553_v3  ;;  %4071 = vmatmul.mubr.msk.bf16.gmra.mrb[56].mxu1 %vm475_vm1, %v2722_v31 }
 0x573   : > { %v2724_v6 = vpack.c.bf16 %v2692_v37, %v2691_v55 }
 0x574   : > { %v2723_v43 = vpack.c.bf16 %v2690_v10, %v2689_v41 }
 0x576   : > { %4074 = vmatprep.mubr.msk.bf16.mxu1 %vm475_vm1, %v2723_v43 }
 0x57a   : > { %4075 = vmatmul.mubr.msk.bf16.gmra.mrb[60].mxu1 %vm475_vm1, %v2724_v6 }
 0x635   : > { %v4064_v9 = vpop.f32.mrb[48].mxu1 }
 0x636   : > { %v3221_v35 = vpop.f32.mrb[49].mxu1  ;;  %v4078_v21 = vadd.f32 %v4064_v9, %v3524_v52 }
 0x637   : > { %v4079_v19 = vadd.f32 %v3524_v52, %v3221_v35  ;;  %v4065_v26 = vpop.f32.mrb[50].mxu1 }
 0x638   : > { %v3224_v5 = vpop.f32.mrb[51].mxu1  ;;  %v4080_v7 = vadd.f32 %v4065_v26, %v3524_v52 }
 0x639   : > { %3300 = vxpose.xlu1.b32.start [1/8] (short) (narrow) %v4079_v19, 32  ;;  %v4081_v36 = vadd.f32 %v3524_v52, %v3224_v5 }
 0x63d   : > { %3301 = vxpose.xlu1.b32.cont [2/8] (short) (narrow) %v4081_v36, 32  ;;  %v4068_v45 = vpop.f32.mrb[52].mxu1 }
 0x63e   : > { %v3237_v2 = vpop.f32.mrb[53].mxu1  ;;  %v4082_v4 = vadd.f32 %v4068_v45, %v3524_v52 }
 0x63f   : > { %v4069_v62 = vpop.f32.mrb[54].mxu1  ;;  %v4083_v11 = vadd.f32 %v3524_v52, %v3237_v2 }
 0x640   : > { %v3240_v0 = vpop.f32.mrb[55].mxu1  ;;  %v4084_v57 = vadd.f32 %v4069_v62, %v3524_v52 }
 0x641   : > { %3302 = vxpose.xlu1.b32.cont [3/8] (short) (narrow) %v4078_v21, 32  ;;  %v4085_v8 = vadd.f32 %v3524_v52, %v3240_v0 }
 0x645   : > { %3303 = vxpose.xlu1.b32.cont [4/8] (short) (narrow) %v4080_v7, 32  ;;  %v4072_v14 = vpop.f32.mrb[56].mxu1 }
 0x646   : > { %v3253_v27 = vpop.f32.mrb[57].mxu1  ;;  %v4086_v48 = vadd.f32 %v4072_v14, %v3524_v52 }
 0x647   : > { %v4087_v42 = vadd.f32 %v3524_v52, %v3253_v27  ;;  %v4073_v18 = vpop.f32.mrb[58].mxu1 }
 0x648   : > { %v3256_v59 = vpop.f32.mrb[59].mxu1  ;;  %v4088_v24 = vadd.f32 %v4073_v18, %v3524_v52 }
 0x649   : > { %3304 = vxpose.xlu1.b32.cont [5/8] (short) (narrow) %v4083_v11, 32  ;;  %3332 = vxpose.xlu0.b32.start [1/8] (short) (narrow) %v4087_v42, 32  ;;  %v4089_v60 = vadd.f32 %v3524_v52, %v3256_v59 }
 0x64d   : > { %3305 = vxpose.xlu1.b32.cont [6/8] (short) (narrow) %v4085_v8, 32  ;;  %3333 = vxpose.xlu0.b32.cont [2/8] (short) (narrow) %v4089_v60, 32  ;;  %v4076_v47 = vpop.f32.mrb[60].mxu1 }
 0x64e   : > { %v3269_v1 = vpop.f32.mrb[61].mxu1  ;;  %v4090_v13 = vadd.f32 %v4076_v47, %v3524_v52 }
 0x64f   : > { %v4077_v51 = vpop.f32.mrb[62].mxu1  ;;  %v4091_v39 = vadd.f32 %v3524_v52, %v3269_v1 }
 0x650   : > { %v3272_v53 = vpop.f32.mrb[63].mxu1  ;;  %v4092_v16 = vadd.f32 %v4077_v51, %v3524_v52 }
 0x651   : > { %3306 = vxpose.xlu1.b32.cont [7/8] (short) (narrow) %v4082_v4, 32  ;;  %3334 = vxpose.xlu0.b32.cont [3/8] (short) (narrow) %v4086_v48, 32  ;;  %v4093_v63 = vadd.f32 %v3524_v52, %v3272_v53 }
 0x655   : > { %3307 = vxpose.xlu1.b32.end [8/8] (short) (narrow) %v4084_v57, 32  ;;  %3335 = vxpose.xlu0.b32.cont [4/8] (short) (narrow) %v4088_v24, 32 }
 0x659   : > { %3336 = vxpose.xlu0.b32.cont [5/8] (short) (narrow) %v4091_v39, 32 }
 0x65d   : > { %3337 = vxpose.xlu0.b32.cont [6/8] (short) (narrow) %v4093_v63, 32 }
 0x661   : > { %3338 = vxpose.xlu0.b32.cont [7/8] (short) (narrow) %v4090_v13, 32 }
 0x665   : > { %3339 = vxpose.xlu0.b32.end [8/8] (short) (narrow) %v4092_v16, 32 }
 0x6b9   : > { %v3316_v38 = vpop.trf.xlu1 }
 0x6ba   : > { %3364 = vst.msk [vmem:[%s231_s26] sm:$0xff] %vm1244_vm2, %v3316_v38 }
 0x6bd   : > { %v3317_v32 = vpop.trf.xlu1 }
 0x6be   : > { %3365 = vst.msk [vmem:[%s231_s26 + $0x8] sm:$0xff] %vm1244_vm2, %v3317_v32 }
 0x6c1   : > { %v3318_v12 = vpop.trf.xlu1 }
 0x6c2   : > { %3366 = vst.msk [vmem:[%s231_s26 + $0x10] sm:$0xff] %vm1244_vm2, %v3318_v12 }
 0x6c5   : > { %v3319_v23 = vpop.trf.xlu1 }
 0x6c6   : > { %3367 = vst.msk [vmem:[%s231_s26 + $0x18] sm:$0xff] %vm1244_vm2, %v3319_v23 }
 0x6c9   : > { %v3348_v22 = vpop.trf.xlu0 }
 0x6ca   : > { %3368 = vst.msk [vmem:[%s231_s26 + $0x20] sm:$0xff] %vm1244_vm2, %v3348_v22 }
 0x6cd   : > { %v3349_v49 = vpop.trf.xlu0 }
 0x6ce   : > { %3369 = vst.msk [vmem:[%s231_s26 + $0x28] sm:$0xff] %vm1244_vm2, %v3349_v49 }
 0x6d1   : > { %v3350_v54 = vpop.trf.xlu0 }
 0x6d2   : > { %3370 = vst.msk [vmem:[%s231_s26 + $0x30] sm:$0xff] %vm1244_vm2, %v3350_v54 }
 0x6d5   : > { %v3351_v30 = vpop.trf.xlu0 }
 0x6d6   : > { %3371 = vst.msk [vmem:[%s231_s26 + $0x38] sm:$0xff] %vm1244_vm2, %v3351_v30 }
 0x6d7 PF: > { %s15_s18 = sadd.s32 1, %s4456_s18  }
 0x6d8   : > { %p12_p4 = scmp.ge.s32.totalorder %s15_s18, 4  }
 0x6da   :  { %14 = sbr.rel (!%p12_p4) target bundleno = 1 (0x1), region = 73 }

</bundles_post_ra>
